<compile_context>
chip_gen: v7x
topology: tpu7x:2x2x1
jax: 0.10.0
libtpu: 0.0.40
codegen_flags: <defaults>
</compile_context>

<pallas_src>
import functools

import numpy as np
import jax
import jax.numpy as jnp
from jax.experimental import pallas as pl
from jax.experimental.pallas import tpu as pltpu


def _conv_out(n, p, k, s):
    # PyTorch conv output size with dilation=1.
    return (n + 2 * p - k) // s + 1


def _pick_bb(batch):
    # Batch-block size for the grid: bounded so the per-tap gather constants
    # stay small (O(bb^2)), divides the batch.
    for cand in (8, 4, 2, 1):
        if batch % cand == 0:
            return cand
    return 1


# ----------------------------------------------------------------------------
# Fused kernel. Layout: rows = (batch, spatial), columns = features.
#   cols1 [bb*n1, cin*k1*k1] -> a1 [bb*n1, 16] -> (gather) cols2 [ns*bb, 256]
#   -> a2 [ns*bb, 32] -> fc1 fold -> h [bb, hidden] -> out [bb, nout]
# ----------------------------------------------------------------------------
def _dqn_kernel(cols1_ref, w1_ref, b1_ref, s_ref, w2_ref, b2_ref,
                wf1_ref, bf1_ref, wout_ref, bout_ref, o_ref, cols2_scr,
                *, nq, c1out, ns, bb):
    f32, bf16 = jnp.float32, jnp.bfloat16

    # --- conv1: [bb*n1, K1] @ [K1, C1out], K1 = cin*8*8 = 256 ----------------
    a1 = jnp.dot(cols1_ref[...], w1_ref[...], preferred_element_type=f32)
    a1 = jnp.maximum(a1 + b1_ref[...], 0.0).astype(bf16)        # [bb*n1, c1out]

    # --- conv2, gather-first: per tap a 0/1 selection matmul copies conv1
    #     rows (exact values, padding taps stay 0) into the im2col scratch ---
    for q in range(nq):                                          # static unroll
        g = jnp.dot(s_ref[q], a1, preferred_element_type=f32)    # [ns*bb, c1out]
        cols2_scr[:, q * c1out:(q + 1) * c1out] = g.astype(bf16)

    # --- conv2 contraction: ONE dense K=256 matmul, f32 accumulate ----------
    a2 = jnp.dot(cols2_scr[...], w2_ref[...], preferred_element_type=f32)
    a2 = jnp.maximum(a2 + b2_ref[...], 0.0).astype(bf16)         # [ns*bb, c2out]

    # --- fc1 with PyTorch's NCHW flatten folded in: loop over the ns spatial
    #     positions; wf1 is pre-split as [ns, c2out, hidden]. First dot
    #     initializes the accumulator (no zero-fill). -------------------------
    h = jnp.dot(a2[0:bb, :], wf1_ref[0], preferred_element_type=f32)
    for s in range(1, ns):
        h = h + jnp.dot(a2[s * bb:(s + 1) * bb, :], wf1_ref[s],
                        preferred_element_type=f32)
    h = jnp.maximum(h + bf1_ref[...], 0.0).astype(bf16)          # [bb, hidden]

    # --- output head, emitted directly in [batch, out] orientation ----------
    o = jnp.dot(h, wout_ref[...], preferred_element_type=f32) + bout_ref[...]
    o_ref[...] = o.astype(o_ref.dtype)                           # [bb, nout]


# ----------------------------------------------------------------------------
# Wrapper-side input glue: im2col for conv1 in the row-major layout the kernel
# expects:  cols1[b*Ho*Wo + ho*Wo + wo, c*k*k + di*k + dj] = xpad[b,c,s*ho+di,s*wo+dj]
# ----------------------------------------------------------------------------
def _im2col_rows(x, k, s, p):
    B, C, H, W = x.shape
    Ho = _conv_out(H, p, k, s)
    Wo = _conv_out(W, p, k, s)
    xp = jnp.pad(x, ((0, 0), (0, 0), (p, p), (p, p)))
    patches = []
    for di in range(k):
        for dj in range(k):
            patches.append(xp[:, :, di:di + s * Ho:s, dj:dj + s * Wo:s])
    cols = jnp.stack(patches, axis=2)                  # [B, C, k*k, Ho, Wo]
    cols = cols.transpose(0, 3, 4, 1, 2)               # [B, Ho, Wo, C, k*k]
    return cols.reshape(B * Ho * Wo, C * k * k)


# ----------------------------------------------------------------------------
# One-time preparation: weight re-layouts (bf16) and constant 0/1 gather
# matrices. Only depends on the batch-BLOCK size (bounded), not total batch.
# ----------------------------------------------------------------------------
def build_dqn_pallas(params, image_size, bb):
    w1, b1 = params["w1"], params["b1"]          # [16, cin, 8, 8], [16]
    w2, b2 = params["w2"], params["b2"]          # [32, 16, 4, 4], [32]
    wf1, bf1 = params["wf1"], params["bf1"]      # [flat, hidden], [hidden]
    wout, bout = params["wout"], params["bout"]  # [hidden, out], [out]

    c1out, cin, k1, _ = w1.shape
    c2out, _, k2, _ = w2.shape
    hidden = wf1.shape[1]
    nout = wout.shape[1]

    h1 = _conv_out(image_size, 2, k1, 4)         # conv1 output spatial
    h2 = _conv_out(h1, 1, k2, 2)                 # conv2 output spatial
    n1, ns, nq = h1 * h1, h2 * h2, k2 * k2
    assert wf1.shape[0] == c2out * ns

    bf16, f32 = jnp.bfloat16, jnp.float32

    # Per-tap 0/1 gather matrices (batch-block local):
    #   s_sel[q, (ho*h2+wo)*bb + b, b*n1 + hi*h1 + wi] = 1
    # with hi = 2*ho + kh - 1, wi = 2*wo + kw - 1 (conv2 stride 2, pad 1);
    # out-of-range taps stay 0 (zero padding).
    s_sel = np.zeros((nq, ns * bb, bb * n1), dtype=np.float32)
    for kh in range(k2):
        for kw in range(k2):
            q = kh * k2 + kw
            for b in range(bb):
                for ho in range(h2):
                    for wo in range(h2):
                        hi = 2 * ho + kh - 1
                        wi = 2 * wo + kw - 1
                        if 0 <= hi < h1 and 0 <= wi < h1:
                            s_sel[q, (ho * h2 + wo) * bb + b,
                                  b * n1 + hi * h1 + wi] = 1.0

    consts = dict(
        w1t=jnp.asarray(w1.reshape(c1out, cin * k1 * k1).T, bf16),   # [K1, C1]
        b1r=jnp.asarray(b1.reshape(1, c1out), f32),
        s_sel=jnp.asarray(s_sel, bf16),                              # [nq, ns*bb, bb*n1]
        w2t=jnp.asarray(w2.transpose(2, 3, 1, 0).reshape(nq * c1out, c2out), bf16),
        b2r=jnp.asarray(b2.reshape(1, c2out), f32),
        # PyTorch flat index co*ns + s -> pre-split per spatial position s.
        wf1s=jnp.asarray(wf1.reshape(c2out, ns, hidden).transpose(1, 0, 2), bf16),
        bf1r=jnp.asarray(bf1.reshape(1, hidden), f32),
        wout=jnp.asarray(wout, bf16),                                # [hidden, out]
        boutr=jnp.asarray(bout.reshape(1, nout), f32),
    )
    dims = dict(k1=k1, stride1=4, pad1=2, n1=n1, ns=ns, nq=nq,
                c1out=c1out, c2out=c2out, hidden=hidden, nout=nout, bb=bb)
    return consts, dims


def dqn_forward(x, consts, *, dims):
    B = x.shape[0]
    bb, n1, ns, nq = dims["bb"], dims["n1"], dims["ns"], dims["nq"]
    c1out, c2out = dims["c1out"], dims["c2out"]
    hidden, nout = dims["hidden"], dims["nout"]
    assert B % bb == 0, (B, bb)
    nb = B // bb

    # conv1 im2col (thin XLA glue; bf16 cast here is the only input rounding).
    cols1 = _im2col_rows(x, dims["k1"], dims["stride1"], dims["pad1"])
    cols1 = cols1.astype(jnp.bfloat16)                 # [B*n1, cin*k1*k1]
    k1sq = cols1.shape[1]

    c = consts

    def whole(a):
        nd = a.ndim
        return pl.BlockSpec(a.shape, lambda *_: (0,) * nd)

    in_arrays = (cols1, c["w1t"], c["b1r"], c["s_sel"], c["w2t"], c["b2r"],
                 c["wf1s"], c["bf1r"], c["wout"], c["boutr"])
    in_specs = ([pl.BlockSpec((bb * n1, k1sq), lambda i: (i, 0))]
                + [whole(a) for a in in_arrays[1:]])

    flops = 2 * (B * n1 * k1sq * c1out                       # conv1
                 + nq * (B * ns) * (bb * n1) * c1out         # conv2 gather
                 + (B * ns) * (nq * c1out) * c2out           # conv2 contract
                 + B * ns * c2out * hidden                   # fc1 (flatten folded)
                 + B * hidden * nout)                        # output head
    bytes_accessed = (sum(int(a.size) * a.dtype.itemsize for a in in_arrays)
                      + B * nout * 4)

    kernel = functools.partial(_dqn_kernel, nq=nq, c1out=c1out, ns=ns, bb=bb)
    out = pl.pallas_call(
        kernel,
        grid=(nb,),
        in_specs=in_specs,
        out_specs=pl.BlockSpec((bb, nout), lambda i: (i, 0)),
        out_shape=jax.ShapeDtypeStruct((B, nout), jnp.float32),
        scratch_shapes=[pltpu.VMEM((ns * bb, nq * c1out), jnp.bfloat16)],
        compiler_params=pltpu.CompilerParams(
            dimension_semantics=("parallel",),       # shard batch blocks (v7x 2 TCs)
            vmem_limit_bytes=32 * 1024 * 1024),
        cost_estimate=pl.CostEstimate(flops=int(flops), transcendentals=0,
                                      bytes_accessed=int(bytes_accessed)),
    )(*in_arrays)
    return out                                               # [B, OUT] directly


# ----------------------------------------------------------------------------
# Params + pure-JAX reference (for correctness check).
# ----------------------------------------------------------------------------
def init_params(key, frame_stack, image_size, hidden_size, out_size):
    h1 = _conv_out(image_size, 2, 8, 4)
    h2 = _conv_out(h1, 1, 4, 2)
    flat = h2 * h2 * 32

    ks = jax.random.split(key, 8)
    scale = 0.05
    return {
        "w1": scale * jax.random.normal(ks[0], (16, frame_stack, 8, 8), jnp.float32),
        "b1": scale * jax.random.normal(ks[1], (16,), jnp.float32),
        "w2": scale * jax.random.normal(ks[2], (32, 16, 4, 4), jnp.float32),
        "b2": scale * jax.random.normal(ks[3], (32,), jnp.float32),
        "wf1": scale * jax.random.normal(ks[4], (flat, hidden_size), jnp.float32),
        "bf1": scale * jax.random.normal(ks[5], (hidden_size,), jnp.float32),
        "wout": scale * jax.random.normal(ks[6], (hidden_size, out_size), jnp.float32),
        "bout": scale * jax.random.normal(ks[7], (out_size,), jnp.float32),
    }


def dqn_reference(x, params):
    def conv(x, w, b, s, p):
        y = jax.lax.conv_general_dilated(
            x, w, window_strides=(s, s), padding=[(p, p), (p, p)],
            dimension_numbers=("NCHW", "OIHW", "NCHW"))
        return y + b.reshape(1, -1, 1, 1)

    x = jax.nn.relu(conv(x, params["w1"], params["b1"], 4, 2))
    x = jax.nn.relu(conv(x, params["w2"], params["b2"], 2, 1))
    x = x.reshape(x.shape[0], -1)
    x = jax.nn.relu(x @ params["wf1"] + params["bf1"])
    return x @ params["wout"] + params["bout"]


if __name__ == "__main__":
    # Config: FRAME_STACK=4, IMAGE_SIZE=32, HIDDEN_SIZE=64, OUT_SIZE=6, batch=2.
    B, FRAME_STACK, IMAGE_SIZE, HIDDEN, OUT = 2, 4, 32, 64, 6

    key = jax.random.PRNGKey(0)
    k_x, k_p = jax.random.split(key)
    x = jax.random.normal(k_x, (B, FRAME_STACK, IMAGE_SIZE, IMAGE_SIZE), jnp.float32)
    params = init_params(k_p, FRAME_STACK, IMAGE_SIZE, HIDDEN, OUT)

    bb = _pick_bb(B)
    consts, dims = build_dqn_pallas(params, IMAGE_SIZE, bb)
    fwd = jax.jit(functools.partial(dqn_forward, dims=dims))

    out = jax.block_until_ready(fwd(x, consts))
    assert out.shape == (B, OUT), out.shape

    ref = jax.block_until_ready(dqn_reference(x, params))
    max_err = float(jnp.max(jnp.abs(out - ref)))
    # bf16 MXU operands with f32 accumulation (no bf16 partial sums anymore).
    assert jnp.allclose(out, ref, rtol=2e-2, atol=2e-2), f"max abs diff {max_err}"

    print("KERNEL_OK")
</pallas_src>

<mosaic_0001>
module attributes {stable_mosaic.version = 11 : i64} {
  func.func @_dqn_kernel(%arg0: i32, %arg1: memref<128x256xbf16, #tpu.memory_space<vmem>>, %arg2: memref<256x16xbf16, #tpu.memory_space<vmem>>, %arg3: memref<1x16xf32, #tpu.memory_space<vmem>>, %arg4: memref<16x32x128xbf16, #tpu.memory_space<vmem>>, %arg5: memref<256x32xbf16, #tpu.memory_space<vmem>>, %arg6: memref<1x32xf32, #tpu.memory_space<vmem>>, %arg7: memref<16x32x64xbf16, #tpu.memory_space<vmem>>, %arg8: memref<1x64xf32, #tpu.memory_space<vmem>>, %arg9: memref<64x6xbf16, #tpu.memory_space<vmem>>, %arg10: memref<1x6xf32, #tpu.memory_space<vmem>>, %arg11: memref<2x6xf32, #tpu.memory_space<vmem>>, %arg12: memref<32x256xbf16, #tpu.memory_space<vmem>>) attributes {dimension_semantics = [#tpu.dimension_semantics<parallel>], iteration_bounds = array<i64: 1>, scalar_prefetch = 0 : i64, scratch_operands = 1 : i64, tpu.core_type = #tpu.core_type<tc>, window_params = [{transform_indices = @transform_0, window_bounds = array<i64: 128, 256>}, {pipeline_mode = #tpu.pipeline_mode<synchronous>, transform_indices = @transform_1, window_bounds = array<i64: 256, 16>}, {pipeline_mode = #tpu.pipeline_mode<synchronous>, transform_indices = @transform_2, window_bounds = array<i64: 1, 16>}, {pipeline_mode = #tpu.pipeline_mode<synchronous>, transform_indices = @transform_3, window_bounds = array<i64: 16, 32, 128>}, {pipeline_mode = #tpu.pipeline_mode<synchronous>, transform_indices = @transform_4, window_bounds = array<i64: 256, 32>}, {pipeline_mode = #tpu.pipeline_mode<synchronous>, transform_indices = @transform_5, window_bounds = array<i64: 1, 32>}, {pipeline_mode = #tpu.pipeline_mode<synchronous>, transform_indices = @transform_6, window_bounds = array<i64: 16, 32, 64>}, {pipeline_mode = #tpu.pipeline_mode<synchronous>, transform_indices = @transform_7, window_bounds = array<i64: 1, 64>}, {pipeline_mode = #tpu.pipeline_mode<synchronous>, transform_indices = @transform_8, window_bounds = array<i64: 64, 6>}, {pipeline_mode = #tpu.pipeline_mode<synchronous>, transform_indices = @transform_9, window_bounds = array<i64: 1, 6>}, {transform_indices = @transform_10, window_bounds = array<i64: 2, 6>}]} {
    %c0 = arith.constant 0 : index
    %c0_0 = arith.constant 0 : index
    %0 = vector.load %arg1[%c0, %c0_0] : memref<128x256xbf16, #tpu.memory_space<vmem>>, vector<128x256xbf16>
    %c0_1 = arith.constant 0 : index
    %c0_2 = arith.constant 0 : index
    %1 = vector.load %arg2[%c0_1, %c0_2] : memref<256x16xbf16, #tpu.memory_space<vmem>>, vector<256x16xbf16>
    %cst = arith.constant dense<0.000000e+00> : vector<128x16xf32>
    %2 = tpu.matmul %0, %1, %cst {dimension_numbers = #tpu.dot_dimension_numbers<[1], [0], [0], [1], [0, 0, 1, 1], [], []>} : vector<128x256xbf16>, vector<256x16xbf16>, vector<128x16xf32> -> vector<128x16xf32>
    %c0_3 = arith.constant 0 : index
    %c0_4 = arith.constant 0 : index
    %3 = vector.load %arg3[%c0_3, %c0_4] : memref<1x16xf32, #tpu.memory_space<vmem>>, vector<1x16xf32>
    %4 = vector.broadcast %3 : vector<1x16xf32> to vector<128x16xf32>
    %5 = arith.addf %2, %4 : vector<128x16xf32>
    %cst_5 = arith.constant 0.000000e+00 : f32
    %6 = vector.broadcast %cst_5 : f32 to vector<128x16xf32>
    %7 = arith.maximumf %5, %6 : vector<128x16xf32>
    %8 = arith.truncf %7 : vector<128x16xf32> to vector<128x16xbf16>
    %c0_6 = arith.constant 0 : index
    %c0_7 = arith.constant 0 : index
    %c0_8 = arith.constant 0 : index
    %9 = vector.load %arg4[%c0_6, %c0_7, %c0_8] : memref<16x32x128xbf16, #tpu.memory_space<vmem>>, vector<1x32x128xbf16>
    %10 = vector.shape_cast %9 : vector<1x32x128xbf16> to vector<32x128xbf16>
    %cst_9 = arith.constant dense<0.000000e+00> : vector<32x16xf32>
    %11 = tpu.matmul %10, %8, %cst_9 {dimension_numbers = #tpu.dot_dimension_numbers<[1], [0], [0], [1], [0, 0, 1, 1], [], []>} : vector<32x128xbf16>, vector<128x16xbf16>, vector<32x16xf32> -> vector<32x16xf32>
    %12 = arith.truncf %11 : vector<32x16xf32> to vector<32x16xbf16>
    %c0_10 = arith.constant 0 : index
    %c0_11 = arith.constant 0 : index
    %13 = vector.load %arg12[%c0_10, %c0_11] : memref<32x256xbf16, #tpu.memory_space<vmem>>, vector<32x16xbf16>
    tpu.vector_store %arg12[%c0_10, %c0_11], %12 {strides = array<i32>} : memref<32x256xbf16, #tpu.memory_space<vmem>>, vector<32x16xbf16>,
    %c1 = arith.constant 1 : index
    %c0_12 = arith.constant 0 : index
    %c0_13 = arith.constant 0 : index
    %14 = vector.load %arg4[%c1, %c0_12, %c0_13] : memref<16x32x128xbf16, #tpu.memory_space<vmem>>, vector<1x32x128xbf16>
    %15 = vector.shape_cast %14 : vector<1x32x128xbf16> to vector<32x128xbf16>
    %cst_14 = arith.constant dense<0.000000e+00> : vector<32x16xf32>
    %16 = tpu.matmul %15, %8, %cst_14 {dimension_numbers = #tpu.dot_dimension_numbers<[1], [0], [0], [1], [0, 0, 1, 1], [], []>} : vector<32x128xbf16>, vector<128x16xbf16>, vector<32x16xf32> -> vector<32x16xf32>
    %17 = arith.truncf %16 : vector<32x16xf32> to vector<32x16xbf16>
    %c0_15 = arith.constant 0 : index
    %c16 = arith.constant 16 : index
    %18 = vector.load %arg12[%c0_15, %c16] : memref<32x256xbf16, #tpu.memory_space<vmem>>, vector<32x16xbf16>
    tpu.vector_store %arg12[%c0_15, %c16], %17 {strides = array<i32>} : memref<32x256xbf16, #tpu.memory_space<vmem>>, vector<32x16xbf16>,
    %c2 = arith.constant 2 : index
    %c0_16 = arith.constant 0 : index
    %c0_17 = arith.constant 0 : index
    %19 = vector.load %arg4[%c2, %c0_16, %c0_17] : memref<16x32x128xbf16, #tpu.memory_space<vmem>>, vector<1x32x128xbf16>
    %20 = vector.shape_cast %19 : vector<1x32x128xbf16> to vector<32x128xbf16>
    %cst_18 = arith.constant dense<0.000000e+00> : vector<32x16xf32>
    %21 = tpu.matmul %20, %8, %cst_18 {dimension_numbers = #tpu.dot_dimension_numbers<[1], [0], [0], [1], [0, 0, 1, 1], [], []>} : vector<32x128xbf16>, vector<128x16xbf16>, vector<32x16xf32> -> vector<32x16xf32>
    %22 = arith.truncf %21 : vector<32x16xf32> to vector<32x16xbf16>
    %c0_19 = arith.constant 0 : index
    %c32 = arith.constant 32 : index
    %23 = vector.load %arg12[%c0_19, %c32] : memref<32x256xbf16, #tpu.memory_space<vmem>>, vector<32x16xbf16>
    tpu.vector_store %arg12[%c0_19, %c32], %22 {strides = array<i32>} : memref<32x256xbf16, #tpu.memory_space<vmem>>, vector<32x16xbf16>,
    %c3 = arith.constant 3 : index
    %c0_20 = arith.constant 0 : index
    %c0_21 = arith.constant 0 : index
    %24 = vector.load %arg4[%c3, %c0_20, %c0_21] : memref<16x32x128xbf16, #tpu.memory_space<vmem>>, vector<1x32x128xbf16>
    %25 = vector.shape_cast %24 : vector<1x32x128xbf16> to vector<32x128xbf16>
    %cst_22 = arith.constant dense<0.000000e+00> : vector<32x16xf32>
    %26 = tpu.matmul %25, %8, %cst_22 {dimension_numbers = #tpu.dot_dimension_numbers<[1], [0], [0], [1], [0, 0, 1, 1], [], []>} : vector<32x128xbf16>, vector<128x16xbf16>, vector<32x16xf32> -> vector<32x16xf32>
    %27 = arith.truncf %26 : vector<32x16xf32> to vector<32x16xbf16>
    %c0_23 = arith.constant 0 : index
    %c48 = arith.constant 48 : index
    %28 = vector.load %arg12[%c0_23, %c48] : memref<32x256xbf16, #tpu.memory_space<vmem>>, vector<32x16xbf16>
    tpu.vector_store %arg12[%c0_23, %c48], %27 {strides = array<i32>} : memref<32x256xbf16, #tpu.memory_space<vmem>>, vector<32x16xbf16>,
    %c4 = arith.constant 4 : index
    %c0_24 = arith.constant 0 : index
    %c0_25 = arith.constant 0 : index
    %29 = vector.load %arg4[%c4, %c0_24, %c0_25] : memref<16x32x128xbf16, #tpu.memory_space<vmem>>, vector<1x32x128xbf16>
    %30 = vector.shape_cast %29 : vector<1x32x128xbf16> to vector<32x128xbf16>
    %cst_26 = arith.constant dense<0.000000e+00> : vector<32x16xf32>
    %31 = tpu.matmul %30, %8, %cst_26 {dimension_numbers = #tpu.dot_dimension_numbers<[1], [0], [0], [1], [0, 0, 1, 1], [], []>} : vector<32x128xbf16>, vector<128x16xbf16>, vector<32x16xf32> -> vector<32x16xf32>
    %32 = arith.truncf %31 : vector<32x16xf32> to vector<32x16xbf16>
    %c0_27 = arith.constant 0 : index
    %c64 = arith.constant 64 : index
    %33 = vector.load %arg12[%c0_27, %c64] : memref<32x256xbf16, #tpu.memory_space<vmem>>, vector<32x16xbf16>
    tpu.vector_store %arg12[%c0_27, %c64], %32 {strides = array<i32>} : memref<32x256xbf16, #tpu.memory_space<vmem>>, vector<32x16xbf16>,
    %c5 = arith.constant 5 : index
    %c0_28 = arith.constant 0 : index
    %c0_29 = arith.constant 0 : index
    %34 = vector.load %arg4[%c5, %c0_28, %c0_29] : memref<16x32x128xbf16, #tpu.memory_space<vmem>>, vector<1x32x128xbf16>
    %35 = vector.shape_cast %34 : vector<1x32x128xbf16> to vector<32x128xbf16>
    %cst_30 = arith.constant dense<0.000000e+00> : vector<32x16xf32>
    %36 = tpu.matmul %35, %8, %cst_30 {dimension_numbers = #tpu.dot_dimension_numbers<[1], [0], [0], [1], [0, 0, 1, 1], [], []>} : vector<32x128xbf16>, vector<128x16xbf16>, vector<32x16xf32> -> vector<32x16xf32>
    %37 = arith.truncf %36 : vector<32x16xf32> to vector<32x16xbf16>
    %c0_31 = arith.constant 0 : index
    %c80 = arith.constant 80 : index
    %38 = vector.load %arg12[%c0_31, %c80] : memref<32x256xbf16, #tpu.memory_space<vmem>>, vector<32x16xbf16>
    tpu.vector_store %arg12[%c0_31, %c80], %37 {strides = array<i32>} : memref<32x256xbf16, #tpu.memory_space<vmem>>, vector<32x16xbf16>,
    %c6 = arith.constant 6 : index
    %c0_32 = arith.constant 0 : index
    %c0_33 = arith.constant 0 : index
    %39 = vector.load %arg4[%c6, %c0_32, %c0_33] : memref<16x32x128xbf16, #tpu.memory_space<vmem>>, vector<1x32x128xbf16>
    %40 = vector.shape_cast %39 : vector<1x32x128xbf16> to vector<32x128xbf16>
    %cst_34 = arith.constant dense<0.000000e+00> : vector<32x16xf32>
    %41 = tpu.matmul %40, %8, %cst_34 {dimension_numbers = #tpu.dot_dimension_numbers<[1], [0], [0], [1], [0, 0, 1, 1], [], []>} : vector<32x128xbf16>, vector<128x16xbf16>, vector<32x16xf32> -> vector<32x16xf32>
    %42 = arith.truncf %41 : vector<32x16xf32> to vector<32x16xbf16>
    %c0_35 = arith.constant 0 : index
    %c96 = arith.constant 96 : index
    %43 = vector.load %arg12[%c0_35, %c96] : memref<32x256xbf16, #tpu.memory_space<vmem>>, vector<32x16xbf16>
    tpu.vector_store %arg12[%c0_35, %c96], %42 {strides = array<i32>} : memref<32x256xbf16, #tpu.memory_space<vmem>>, vector<32x16xbf16>,
    %c7 = arith.constant 7 : index
    %c0_36 = arith.constant 0 : index
    %c0_37 = arith.constant 0 : index
    %44 = vector.load %arg4[%c7, %c0_36, %c0_37] : memref<16x32x128xbf16, #tpu.memory_space<vmem>>, vector<1x32x128xbf16>
    %45 = vector.shape_cast %44 : vector<1x32x128xbf16> to vector<32x128xbf16>
    %cst_38 = arith.constant dense<0.000000e+00> : vector<32x16xf32>
    %46 = tpu.matmul %45, %8, %cst_38 {dimension_numbers = #tpu.dot_dimension_numbers<[1], [0], [0], [1], [0, 0, 1, 1], [], []>} : vector<32x128xbf16>, vector<128x16xbf16>, vector<32x16xf32> -> vector<32x16xf32>
    %47 = arith.truncf %46 : vector<32x16xf32> to vector<32x16xbf16>
    %c0_39 = arith.constant 0 : index
    %c112 = arith.constant 112 : index
    %48 = vector.load %arg12[%c0_39, %c112] : memref<32x256xbf16, #tpu.memory_space<vmem>>, vector<32x16xbf16>
    tpu.vector_store %arg12[%c0_39, %c112], %47 {strides = array<i32>} : memref<32x256xbf16, #tpu.memory_space<vmem>>, vector<32x16xbf16>,
    %c8 = arith.constant 8 : index
    %c0_40 = arith.constant 0 : index
    %c0_41 = arith.constant 0 : index
    %49 = vector.load %arg4[%c8, %c0_40, %c0_41] : memref<16x32x128xbf16, #tpu.memory_space<vmem>>, vector<1x32x128xbf16>
    %50 = vector.shape_cast %49 : vector<1x32x128xbf16> to vector<32x128xbf16>
    %cst_42 = arith.constant dense<0.000000e+00> : vector<32x16xf32>
    %51 = tpu.matmul %50, %8, %cst_42 {dimension_numbers = #tpu.dot_dimension_numbers<[1], [0], [0], [1], [0, 0, 1, 1], [], []>} : vector<32x128xbf16>, vector<128x16xbf16>, vector<32x16xf32> -> vector<32x16xf32>
    %52 = arith.truncf %51 : vector<32x16xf32> to vector<32x16xbf16>
    %c0_43 = arith.constant 0 : index
    %c128 = arith.constant 128 : index
    %53 = vector.load %arg12[%c0_43, %c128] : memref<32x256xbf16, #tpu.memory_space<vmem>>, vector<32x16xbf16>
    tpu.vector_store %arg12[%c0_43, %c128], %52 {strides = array<i32>} : memref<32x256xbf16, #tpu.memory_space<vmem>>, vector<32x16xbf16>,
    %c9 = arith.constant 9 : index
    %c0_44 = arith.constant 0 : index
    %c0_45 = arith.constant 0 : index
    %54 = vector.load %arg4[%c9, %c0_44, %c0_45] : memref<16x32x128xbf16, #tpu.memory_space<vmem>>, vector<1x32x128xbf16>
    %55 = vector.shape_cast %54 : vector<1x32x128xbf16> to vector<32x128xbf16>
    %cst_46 = arith.constant dense<0.000000e+00> : vector<32x16xf32>
    %56 = tpu.matmul %55, %8, %cst_46 {dimension_numbers = #tpu.dot_dimension_numbers<[1], [0], [0], [1], [0, 0, 1, 1], [], []>} : vector<32x128xbf16>, vector<128x16xbf16>, vector<32x16xf32> -> vector<32x16xf32>
    %57 = arith.truncf %56 : vector<32x16xf32> to vector<32x16xbf16>
    %c0_47 = arith.constant 0 : index
    %c144 = arith.constant 144 : index
    %58 = vector.load %arg12[%c0_47, %c144] : memref<32x256xbf16, #tpu.memory_space<vmem>>, vector<32x16xbf16>
    tpu.vector_store %arg12[%c0_47, %c144], %57 {strides = array<i32>} : memref<32x256xbf16, #tpu.memory_space<vmem>>, vector<32x16xbf16>,
    %c10 = arith.constant 10 : index
    %c0_48 = arith.constant 0 : index
    %c0_49 = arith.constant 0 : index
    %59 = vector.load %arg4[%c10, %c0_48, %c0_49] : memref<16x32x128xbf16, #tpu.memory_space<vmem>>, vector<1x32x128xbf16>
    %60 = vector.shape_cast %59 : vector<1x32x128xbf16> to vector<32x128xbf16>
    %cst_50 = arith.constant dense<0.000000e+00> : vector<32x16xf32>
    %61 = tpu.matmul %60, %8, %cst_50 {dimension_numbers = #tpu.dot_dimension_numbers<[1], [0], [0], [1], [0, 0, 1, 1], [], []>} : vector<32x128xbf16>, vector<128x16xbf16>, vector<32x16xf32> -> vector<32x16xf32>
    %62 = arith.truncf %61 : vector<32x16xf32> to vector<32x16xbf16>
    %c0_51 = arith.constant 0 : index
    %c160 = arith.constant 160 : index
    %63 = vector.load %arg12[%c0_51, %c160] : memref<32x256xbf16, #tpu.memory_space<vmem>>, vector<32x16xbf16>
    tpu.vector_store %arg12[%c0_51, %c160], %62 {strides = array<i32>} : memref<32x256xbf16, #tpu.memory_space<vmem>>, vector<32x16xbf16>,
    %c11 = arith.constant 11 : index
    %c0_52 = arith.constant 0 : index
    %c0_53 = arith.constant 0 : index
    %64 = vector.load %arg4[%c11, %c0_52, %c0_53] : memref<16x32x128xbf16, #tpu.memory_space<vmem>>, vector<1x32x128xbf16>
    %65 = vector.shape_cast %64 : vector<1x32x128xbf16> to vector<32x128xbf16>
    %cst_54 = arith.constant dense<0.000000e+00> : vector<32x16xf32>
    %66 = tpu.matmul %65, %8, %cst_54 {dimension_numbers = #tpu.dot_dimension_numbers<[1], [0], [0], [1], [0, 0, 1, 1], [], []>} : vector<32x128xbf16>, vector<128x16xbf16>, vector<32x16xf32> -> vector<32x16xf32>
    %67 = arith.truncf %66 : vector<32x16xf32> to vector<32x16xbf16>
    %c0_55 = arith.constant 0 : index
    %c176 = arith.constant 176 : index
    %68 = vector.load %arg12[%c0_55, %c176] : memref<32x256xbf16, #tpu.memory_space<vmem>>, vector<32x16xbf16>
    tpu.vector_store %arg12[%c0_55, %c176], %67 {strides = array<i32>} : memref<32x256xbf16, #tpu.memory_space<vmem>>, vector<32x16xbf16>,
    %c12 = arith.constant 12 : index
    %c0_56 = arith.constant 0 : index
    %c0_57 = arith.constant 0 : index
    %69 = vector.load %arg4[%c12, %c0_56, %c0_57] : memref<16x32x128xbf16, #tpu.memory_space<vmem>>, vector<1x32x128xbf16>
    %70 = vector.shape_cast %69 : vector<1x32x128xbf16> to vector<32x128xbf16>
    %cst_58 = arith.constant dense<0.000000e+00> : vector<32x16xf32>
    %71 = tpu.matmul %70, %8, %cst_58 {dimension_numbers = #tpu.dot_dimension_numbers<[1], [0], [0], [1], [0, 0, 1, 1], [], []>} : vector<32x128xbf16>, vector<128x16xbf16>, vector<32x16xf32> -> vector<32x16xf32>
    %72 = arith.truncf %71 : vector<32x16xf32> to vector<32x16xbf16>
    %c0_59 = arith.constant 0 : index
    %c192 = arith.constant 192 : index
    %73 = vector.load %arg12[%c0_59, %c192] : memref<32x256xbf16, #tpu.memory_space<vmem>>, vector<32x16xbf16>
    tpu.vector_store %arg12[%c0_59, %c192], %72 {strides = array<i32>} : memref<32x256xbf16, #tpu.memory_space<vmem>>, vector<32x16xbf16>,
    %c13 = arith.constant 13 : index
    %c0_60 = arith.constant 0 : index
    %c0_61 = arith.constant 0 : index
    %74 = vector.load %arg4[%c13, %c0_60, %c0_61] : memref<16x32x128xbf16, #tpu.memory_space<vmem>>, vector<1x32x128xbf16>
    %75 = vector.shape_cast %74 : vector<1x32x128xbf16> to vector<32x128xbf16>
    %cst_62 = arith.constant dense<0.000000e+00> : vector<32x16xf32>
    %76 = tpu.matmul %75, %8, %cst_62 {dimension_numbers = #tpu.dot_dimension_numbers<[1], [0], [0], [1], [0, 0, 1, 1], [], []>} : vector<32x128xbf16>, vector<128x16xbf16>, vector<32x16xf32> -> vector<32x16xf32>
    %77 = arith.truncf %76 : vector<32x16xf32> to vector<32x16xbf16>
    %c0_63 = arith.constant 0 : index
    %c208 = arith.constant 208 : index
    %78 = vector.load %arg12[%c0_63, %c208] : memref<32x256xbf16, #tpu.memory_space<vmem>>, vector<32x16xbf16>
    tpu.vector_store %arg12[%c0_63, %c208], %77 {strides = array<i32>} : memref<32x256xbf16, #tpu.memory_space<vmem>>, vector<32x16xbf16>,
    %c14 = arith.constant 14 : index
    %c0_64 = arith.constant 0 : index
    %c0_65 = arith.constant 0 : index
    %79 = vector.load %arg4[%c14, %c0_64, %c0_65] : memref<16x32x128xbf16, #tpu.memory_space<vmem>>, vector<1x32x128xbf16>
    %80 = vector.shape_cast %79 : vector<1x32x128xbf16> to vector<32x128xbf16>
    %cst_66 = arith.constant dense<0.000000e+00> : vector<32x16xf32>
    %81 = tpu.matmul %80, %8, %cst_66 {dimension_numbers = #tpu.dot_dimension_numbers<[1], [0], [0], [1], [0, 0, 1, 1], [], []>} : vector<32x128xbf16>, vector<128x16xbf16>, vector<32x16xf32> -> vector<32x16xf32>
    %82 = arith.truncf %81 : vector<32x16xf32> to vector<32x16xbf16>
    %c0_67 = arith.constant 0 : index
    %c224 = arith.constant 224 : index
    %83 = vector.load %arg12[%c0_67, %c224] : memref<32x256xbf16, #tpu.memory_space<vmem>>, vector<32x16xbf16>
    tpu.vector_store %arg12[%c0_67, %c224], %82 {strides = array<i32>} : memref<32x256xbf16, #tpu.memory_space<vmem>>, vector<32x16xbf16>,
    %c15 = arith.constant 15 : index
    %c0_68 = arith.constant 0 : index
    %c0_69 = arith.constant 0 : index
    %84 = vector.load %arg4[%c15, %c0_68, %c0_69] : memref<16x32x128xbf16, #tpu.memory_space<vmem>>, vector<1x32x128xbf16>
    %85 = vector.shape_cast %84 : vector<1x32x128xbf16> to vector<32x128xbf16>
    %cst_70 = arith.constant dense<0.000000e+00> : vector<32x16xf32>
    %86 = tpu.matmul %85, %8, %cst_70 {dimension_numbers = #tpu.dot_dimension_numbers<[1], [0], [0], [1], [0, 0, 1, 1], [], []>} : vector<32x128xbf16>, vector<128x16xbf16>, vector<32x16xf32> -> vector<32x16xf32>
    %87 = arith.truncf %86 : vector<32x16xf32> to vector<32x16xbf16>
    %c0_71 = arith.constant 0 : index
    %c240 = arith.constant 240 : index
    %88 = vector.load %arg12[%c0_71, %c240] : memref<32x256xbf16, #tpu.memory_space<vmem>>, vector<32x16xbf16>
    tpu.vector_store %arg12[%c0_71, %c240], %87 {strides = array<i32>} : memref<32x256xbf16, #tpu.memory_space<vmem>>, vector<32x16xbf16>,
    %c0_72 = arith.constant 0 : index
    %c0_73 = arith.constant 0 : index
    %89 = vector.load %arg12[%c0_72, %c0_73] : memref<32x256xbf16, #tpu.memory_space<vmem>>, vector<32x256xbf16>
    %c0_74 = arith.constant 0 : index
    %c0_75 = arith.constant 0 : index
    %90 = vector.load %arg5[%c0_74, %c0_75] : memref<256x32xbf16, #tpu.memory_space<vmem>>, vector<256x32xbf16>
    %cst_76 = arith.constant dense<0.000000e+00> : vector<32x32xf32>
    %91 = tpu.matmul %89, %90, %cst_76 {dimension_numbers = #tpu.dot_dimension_numbers<[1], [0], [0], [1], [0, 0, 1, 1], [], []>} : vector<32x256xbf16>, vector<256x32xbf16>, vector<32x32xf32> -> vector<32x32xf32>
    %c0_77 = arith.constant 0 : index
    %c0_78 = arith.constant 0 : index
    %92 = vector.load %arg6[%c0_77, %c0_78] : memref<1x32xf32, #tpu.memory_space<vmem>>, vector<1x32xf32>
    %93 = vector.broadcast %92 : vector<1x32xf32> to vector<32x32xf32>
    %94 = arith.addf %91, %93 : vector<32x32xf32>
    %cst_79 = arith.constant 0.000000e+00 : f32
    %95 = vector.broadcast %cst_79 : f32 to vector<32x32xf32>
    %96 = arith.maximumf %94, %95 : vector<32x32xf32>
    %97 = arith.truncf %96 : vector<32x32xf32> to vector<32x32xbf16>
    %98 = vector.extract_strided_slice %97 {offsets = [0, 0], sizes = [2, 32], strides = [1, 1]} : vector<32x32xbf16> to vector<2x32xbf16>
    %c0_80 = arith.constant 0 : index
    %c0_81 = arith.constant 0 : index
    %c0_82 = arith.constant 0 : index
    %99 = vector.load %arg7[%c0_80, %c0_81, %c0_82] : memref<16x32x64xbf16, #tpu.memory_space<vmem>>, vector<1x32x64xbf16>
    %100 = vector.shape_cast %99 : vector<1x32x64xbf16> to vector<32x64xbf16>
    %cst_83 = arith.constant dense<0.000000e+00> : vector<2x64xf32>
    %101 = tpu.matmul %98, %100, %cst_83 {dimension_numbers = #tpu.dot_dimension_numbers<[1], [0], [0], [1], [0, 0, 1, 1], [], []>} : vector<2x32xbf16>, vector<32x64xbf16>, vector<2x64xf32> -> vector<2x64xf32>
    %102 = vector.extract_strided_slice %97 {offsets = [2, 0], sizes = [2, 32], strides = [1, 1]} : vector<32x32xbf16> to vector<2x32xbf16>
    %c1_84 = arith.constant 1 : index
    %c0_85 = arith.constant 0 : index
    %c0_86 = arith.constant 0 : index
    %103 = vector.load %arg7[%c1_84, %c0_85, %c0_86] : memref<16x32x64xbf16, #tpu.memory_space<vmem>>, vector<1x32x64xbf16>
    %104 = vector.shape_cast %103 : vector<1x32x64xbf16> to vector<32x64xbf16>
    %cst_87 = arith.constant dense<0.000000e+00> : vector<2x64xf32>
    %105 = tpu.matmul %102, %104, %cst_87 {dimension_numbers = #tpu.dot_dimension_numbers<[1], [0], [0], [1], [0, 0, 1, 1], [], []>} : vector<2x32xbf16>, vector<32x64xbf16>, vector<2x64xf32> -> vector<2x64xf32>
    %106 = arith.addf %101, %105 : vector<2x64xf32>
    %107 = vector.extract_strided_slice %97 {offsets = [4, 0], sizes = [2, 32], strides = [1, 1]} : vector<32x32xbf16> to vector<2x32xbf16>
    %c2_88 = arith.constant 2 : index
    %c0_89 = arith.constant 0 : index
    %c0_90 = arith.constant 0 : index
    %108 = vector.load %arg7[%c2_88, %c0_89, %c0_90] : memref<16x32x64xbf16, #tpu.memory_space<vmem>>, vector<1x32x64xbf16>
    %109 = vector.shape_cast %108 : vector<1x32x64xbf16> to vector<32x64xbf16>
    %cst_91 = arith.constant dense<0.000000e+00> : vector<2x64xf32>
    %110 = tpu.matmul %107, %109, %cst_91 {dimension_numbers = #tpu.dot_dimension_numbers<[1], [0], [0], [1], [0, 0, 1, 1], [], []>} : vector<2x32xbf16>, vector<32x64xbf16>, vector<2x64xf32> -> vector<2x64xf32>
    %111 = arith.addf %106, %110 : vector<2x64xf32>
    %112 = vector.extract_strided_slice %97 {offsets = [6, 0], sizes = [2, 32], strides = [1, 1]} : vector<32x32xbf16> to vector<2x32xbf16>
    %c3_92 = arith.constant 3 : index
    %c0_93 = arith.constant 0 : index
    %c0_94 = arith.constant 0 : index
    %113 = vector.load %arg7[%c3_92, %c0_93, %c0_94] : memref<16x32x64xbf16, #tpu.memory_space<vmem>>, vector<1x32x64xbf16>
    %114 = vector.shape_cast %113 : vector<1x32x64xbf16> to vector<32x64xbf16>
    %cst_95 = arith.constant dense<0.000000e+00> : vector<2x64xf32>
    %115 = tpu.matmul %112, %114, %cst_95 {dimension_numbers = #tpu.dot_dimension_numbers<[1], [0], [0], [1], [0, 0, 1, 1], [], []>} : vector<2x32xbf16>, vector<32x64xbf16>, vector<2x64xf32> -> vector<2x64xf32>
    %116 = arith.addf %111, %115 : vector<2x64xf32>
    %117 = vector.extract_strided_slice %97 {offsets = [8, 0], sizes = [2, 32], strides = [1, 1]} : vector<32x32xbf16> to vector<2x32xbf16>
    %c4_96 = arith.constant 4 : index
    %c0_97 = arith.constant 0 : index
    %c0_98 = arith.constant 0 : index
    %118 = vector.load %arg7[%c4_96, %c0_97, %c0_98] : memref<16x32x64xbf16, #tpu.memory_space<vmem>>, vector<1x32x64xbf16>
    %119 = vector.shape_cast %118 : vector<1x32x64xbf16> to vector<32x64xbf16>
    %cst_99 = arith.constant dense<0.000000e+00> : vector<2x64xf32>
    %120 = tpu.matmul %117, %119, %cst_99 {dimension_numbers = #tpu.dot_dimension_numbers<[1], [0], [0], [1], [0, 0, 1, 1], [], []>} : vector<2x32xbf16>, vector<32x64xbf16>, vector<2x64xf32> -> vector<2x64xf32>
    %121 = arith.addf %116, %120 : vector<2x64xf32>
    %122 = vector.extract_strided_slice %97 {offsets = [10, 0], sizes = [2, 32], strides = [1, 1]} : vector<32x32xbf16> to vector<2x32xbf16>
    %c5_100 = arith.constant 5 : index
    %c0_101 = arith.constant 0 : index
    %c0_102 = arith.constant 0 : index
    %123 = vector.load %arg7[%c5_100, %c0_101, %c0_102] : memref<16x32x64xbf16, #tpu.memory_space<vmem>>, vector<1x32x64xbf16>
    %124 = vector.shape_cast %123 : vector<1x32x64xbf16> to vector<32x64xbf16>
    %cst_103 = arith.constant dense<0.000000e+00> : vector<2x64xf32>
    %125 = tpu.matmul %122, %124, %cst_103 {dimension_numbers = #tpu.dot_dimension_numbers<[1], [0], [0], [1], [0, 0, 1, 1], [], []>} : vector<2x32xbf16>, vector<32x64xbf16>, vector<2x64xf32> -> vector<2x64xf32>
    %126 = arith.addf %121, %125 : vector<2x64xf32>
    %127 = vector.extract_strided_slice %97 {offsets = [12, 0], sizes = [2, 32], strides = [1, 1]} : vector<32x32xbf16> to vector<2x32xbf16>
    %c6_104 = arith.constant 6 : index
    %c0_105 = arith.constant 0 : index
    %c0_106 = arith.constant 0 : index
    %128 = vector.load %arg7[%c6_104, %c0_105, %c0_106] : memref<16x32x64xbf16, #tpu.memory_space<vmem>>, vector<1x32x64xbf16>
    %129 = vector.shape_cast %128 : vector<1x32x64xbf16> to vector<32x64xbf16>
    %cst_107 = arith.constant dense<0.000000e+00> : vector<2x64xf32>
    %130 = tpu.matmul %127, %129, %cst_107 {dimension_numbers = #tpu.dot_dimension_numbers<[1], [0], [0], [1], [0, 0, 1, 1], [], []>} : vector<2x32xbf16>, vector<32x64xbf16>, vector<2x64xf32> -> vector<2x64xf32>
    %131 = arith.addf %126, %130 : vector<2x64xf32>
    %132 = vector.extract_strided_slice %97 {offsets = [14, 0], sizes = [2, 32], strides = [1, 1]} : vector<32x32xbf16> to vector<2x32xbf16>
    %c7_108 = arith.constant 7 : index
    %c0_109 = arith.constant 0 : index
    %c0_110 = arith.constant 0 : index
    %133 = vector.load %arg7[%c7_108, %c0_109, %c0_110] : memref<16x32x64xbf16, #tpu.memory_space<vmem>>, vector<1x32x64xbf16>
    %134 = vector.shape_cast %133 : vector<1x32x64xbf16> to vector<32x64xbf16>
    %cst_111 = arith.constant dense<0.000000e+00> : vector<2x64xf32>
    %135 = tpu.matmul %132, %134, %cst_111 {dimension_numbers = #tpu.dot_dimension_numbers<[1], [0], [0], [1], [0, 0, 1, 1], [], []>} : vector<2x32xbf16>, vector<32x64xbf16>, vector<2x64xf32> -> vector<2x64xf32>
    %136 = arith.addf %131, %135 : vector<2x64xf32>
    %137 = vector.extract_strided_slice %97 {offsets = [16, 0], sizes = [2, 32], strides = [1, 1]} : vector<32x32xbf16> to vector<2x32xbf16>
    %c8_112 = arith.constant 8 : index
    %c0_113 = arith.constant 0 : index
    %c0_114 = arith.constant 0 : index
    %138 = vector.load %arg7[%c8_112, %c0_113, %c0_114] : memref<16x32x64xbf16, #tpu.memory_space<vmem>>, vector<1x32x64xbf16>
    %139 = vector.shape_cast %138 : vector<1x32x64xbf16> to vector<32x64xbf16>
    %cst_115 = arith.constant dense<0.000000e+00> : vector<2x64xf32>
    %140 = tpu.matmul %137, %139, %cst_115 {dimension_numbers = #tpu.dot_dimension_numbers<[1], [0], [0], [1], [0, 0, 1, 1], [], []>} : vector<2x32xbf16>, vector<32x64xbf16>, vector<2x64xf32> -> vector<2x64xf32>
    %141 = arith.addf %136, %140 : vector<2x64xf32>
    %142 = vector.extract_strided_slice %97 {offsets = [18, 0], sizes = [2, 32], strides = [1, 1]} : vector<32x32xbf16> to vector<2x32xbf16>
    %c9_116 = arith.constant 9 : index
    %c0_117 = arith.constant 0 : index
    %c0_118 = arith.constant 0 : index
    %143 = vector.load %arg7[%c9_116, %c0_117, %c0_118] : memref<16x32x64xbf16, #tpu.memory_space<vmem>>, vector<1x32x64xbf16>
    %144 = vector.shape_cast %143 : vector<1x32x64xbf16> to vector<32x64xbf16>
    %cst_119 = arith.constant dense<0.000000e+00> : vector<2x64xf32>
    %145 = tpu.matmul %142, %144, %cst_119 {dimension_numbers = #tpu.dot_dimension_numbers<[1], [0], [0], [1], [0, 0, 1, 1], [], []>} : vector<2x32xbf16>, vector<32x64xbf16>, vector<2x64xf32> -> vector<2x64xf32>
    %146 = arith.addf %141, %145 : vector<2x64xf32>
    %147 = vector.extract_strided_slice %97 {offsets = [20, 0], sizes = [2, 32], strides = [1, 1]} : vector<32x32xbf16> to vector<2x32xbf16>
    %c10_120 = arith.constant 10 : index
    %c0_121 = arith.constant 0 : index
    %c0_122 = arith.constant 0 : index
    %148 = vector.load %arg7[%c10_120, %c0_121, %c0_122] : memref<16x32x64xbf16, #tpu.memory_space<vmem>>, vector<1x32x64xbf16>
    %149 = vector.shape_cast %148 : vector<1x32x64xbf16> to vector<32x64xbf16>
    %cst_123 = arith.constant dense<0.000000e+00> : vector<2x64xf32>
    %150 = tpu.matmul %147, %149, %cst_123 {dimension_numbers = #tpu.dot_dimension_numbers<[1], [0], [0], [1], [0, 0, 1, 1], [], []>} : vector<2x32xbf16>, vector<32x64xbf16>, vector<2x64xf32> -> vector<2x64xf32>
    %151 = arith.addf %146, %150 : vector<2x64xf32>
    %152 = vector.extract_strided_slice %97 {offsets = [22, 0], sizes = [2, 32], strides = [1, 1]} : vector<32x32xbf16> to vector<2x32xbf16>
    %c11_124 = arith.constant 11 : index
    %c0_125 = arith.constant 0 : index
    %c0_126 = arith.constant 0 : index
    %153 = vector.load %arg7[%c11_124, %c0_125, %c0_126] : memref<16x32x64xbf16, #tpu.memory_space<vmem>>, vector<1x32x64xbf16>
    %154 = vector.shape_cast %153 : vector<1x32x64xbf16> to vector<32x64xbf16>
    %cst_127 = arith.constant dense<0.000000e+00> : vector<2x64xf32>
    %155 = tpu.matmul %152, %154, %cst_127 {dimension_numbers = #tpu.dot_dimension_numbers<[1], [0], [0], [1], [0, 0, 1, 1], [], []>} : vector<2x32xbf16>, vector<32x64xbf16>, vector<2x64xf32> -> vector<2x64xf32>
    %156 = arith.addf %151, %155 : vector<2x64xf32>
    %157 = vector.extract_strided_slice %97 {offsets = [24, 0], sizes = [2, 32], strides = [1, 1]} : vector<32x32xbf16> to vector<2x32xbf16>
    %c12_128 = arith.constant 12 : index
    %c0_129 = arith.constant 0 : index
    %c0_130 = arith.constant 0 : index
    %158 = vector.load %arg7[%c12_128, %c0_129, %c0_130] : memref<16x32x64xbf16, #tpu.memory_space<vmem>>, vector<1x32x64xbf16>
    %159 = vector.shape_cast %158 : vector<1x32x64xbf16> to vector<32x64xbf16>
    %cst_131 = arith.constant dense<0.000000e+00> : vector<2x64xf32>
    %160 = tpu.matmul %157, %159, %cst_131 {dimension_numbers = #tpu.dot_dimension_numbers<[1], [0], [0], [1], [0, 0, 1, 1], [], []>} : vector<2x32xbf16>, vector<32x64xbf16>, vector<2x64xf32> -> vector<2x64xf32>
    %161 = arith.addf %156, %160 : vector<2x64xf32>
    %162 = vector.extract_strided_slice %97 {offsets = [26, 0], sizes = [2, 32], strides = [1, 1]} : vector<32x32xbf16> to vector<2x32xbf16>
    %c13_132 = arith.constant 13 : index
    %c0_133 = arith.constant 0 : index
    %c0_134 = arith.constant 0 : index
    %163 = vector.load %arg7[%c13_132, %c0_133, %c0_134] : memref<16x32x64xbf16, #tpu.memory_space<vmem>>, vector<1x32x64xbf16>
    %164 = vector.shape_cast %163 : vector<1x32x64xbf16> to vector<32x64xbf16>
    %cst_135 = arith.constant dense<0.000000e+00> : vector<2x64xf32>
    %165 = tpu.matmul %162, %164, %cst_135 {dimension_numbers = #tpu.dot_dimension_numbers<[1], [0], [0], [1], [0, 0, 1, 1], [], []>} : vector<2x32xbf16>, vector<32x64xbf16>, vector<2x64xf32> -> vector<2x64xf32>
    %166 = arith.addf %161, %165 : vector<2x64xf32>
    %167 = vector.extract_strided_slice %97 {offsets = [28, 0], sizes = [2, 32], strides = [1, 1]} : vector<32x32xbf16> to vector<2x32xbf16>
    %c14_136 = arith.constant 14 : index
    %c0_137 = arith.constant 0 : index
    %c0_138 = arith.constant 0 : index
    %168 = vector.load %arg7[%c14_136, %c0_137, %c0_138] : memref<16x32x64xbf16, #tpu.memory_space<vmem>>, vector<1x32x64xbf16>
    %169 = vector.shape_cast %168 : vector<1x32x64xbf16> to vector<32x64xbf16>
    %cst_139 = arith.constant dense<0.000000e+00> : vector<2x64xf32>
    %170 = tpu.matmul %167, %169, %cst_139 {dimension_numbers = #tpu.dot_dimension_numbers<[1], [0], [0], [1], [0, 0, 1, 1], [], []>} : vector<2x32xbf16>, vector<32x64xbf16>, vector<2x64xf32> -> vector<2x64xf32>
    %171 = arith.addf %166, %170 : vector<2x64xf32>
    %172 = vector.extract_strided_slice %97 {offsets = [30, 0], sizes = [2, 32], strides = [1, 1]} : vector<32x32xbf16> to vector<2x32xbf16>
    %c15_140 = arith.constant 15 : index
    %c0_141 = arith.constant 0 : index
    %c0_142 = arith.constant 0 : index
    %173 = vector.load %arg7[%c15_140, %c0_141, %c0_142] : memref<16x32x64xbf16, #tpu.memory_space<vmem>>, vector<1x32x64xbf16>
    %174 = vector.shape_cast %173 : vector<1x32x64xbf16> to vector<32x64xbf16>
    %cst_143 = arith.constant dense<0.000000e+00> : vector<2x64xf32>
    %175 = tpu.matmul %172, %174, %cst_143 {dimension_numbers = #tpu.dot_dimension_numbers<[1], [0], [0], [1], [0, 0, 1, 1], [], []>} : vector<2x32xbf16>, vector<32x64xbf16>, vector<2x64xf32> -> vector<2x64xf32>
    %176 = arith.addf %171, %175 : vector<2x64xf32>
    %c0_144 = arith.constant 0 : index
    %c0_145 = arith.constant 0 : index
    %177 = vector.load %arg8[%c0_144, %c0_145] : memref<1x64xf32, #tpu.memory_space<vmem>>, vector<1x64xf32>
    %178 = vector.broadcast %177 : vector<1x64xf32> to vector<2x64xf32>
    %179 = arith.addf %176, %178 : vector<2x64xf32>
    %cst_146 = arith.constant 0.000000e+00 : f32
    %180 = vector.broadcast %cst_146 : f32 to vector<2x64xf32>
    %181 = arith.maximumf %179, %180 : vector<2x64xf32>
    %182 = arith.truncf %181 : vector<2x64xf32> to vector<2x64xbf16>
    %c0_147 = arith.constant 0 : index
    %c0_148 = arith.constant 0 : index
    %183 = vector.load %arg9[%c0_147, %c0_148] : memref<64x6xbf16, #tpu.memory_space<vmem>>, vector<64x6xbf16>
    %cst_149 = arith.constant dense<0.000000e+00> : vector<2x6xf32>
    %184 = tpu.matmul %182, %183, %cst_149 {dimension_numbers = #tpu.dot_dimension_numbers<[1], [0], [0], [1], [0, 0, 1, 1], [], []>} : vector<2x64xbf16>, vector<64x6xbf16>, vector<2x6xf32> -> vector<2x6xf32>
    %c0_150 = arith.constant 0 : index
    %c0_151 = arith.constant 0 : index
    %185 = vector.load %arg10[%c0_150, %c0_151] : memref<1x6xf32, #tpu.memory_space<vmem>>, vector<1x6xf32>
    %186 = vector.broadcast %185 : vector<1x6xf32> to vector<2x6xf32>
    %187 = arith.addf %184, %186 : vector<2x6xf32>
    %c0_152 = arith.constant 0 : index
    %c0_153 = arith.constant 0 : index
    %188 = vector.load %arg11[%c0_152, %c0_153] : memref<2x6xf32, #tpu.memory_space<vmem>>, vector<2x6xf32>
    tpu.vector_store %arg11[%c0_152, %c0_153], %187 {strides = array<i32>} : memref<2x6xf32, #tpu.memory_space<vmem>>, vector<2x6xf32>,
    return
  }
  func.func @transform_0(%arg0: i32) -> (i32, i32) {
    %c0_i32 = arith.constant 0 : i32
    %c0_i32_0 = arith.constant 0 : i32
    return %arg0, %c0_i32 : i32, i32
  }
  func.func @transform_1(%arg0: i32) -> (i32, i32) {
    %c0_i32 = arith.constant 0 : i32
    %c0_i32_0 = arith.constant 0 : i32
    %c0_i32_1 = arith.constant 0 : i32
    return %c0_i32, %c0_i32_0 : i32, i32
  }
  func.func @transform_2(%arg0: i32) -> (i32, i32) {
    %c0_i32 = arith.constant 0 : i32
    %c0_i32_0 = arith.constant 0 : i32
    %c0_i32_1 = arith.constant 0 : i32
    return %c0_i32, %c0_i32_0 : i32, i32
  }
  func.func @transform_3(%arg0: i32) -> (i32, i32, i32) {
    %c0_i32 = arith.constant 0 : i32
    %c0_i32_0 = arith.constant 0 : i32
    %c0_i32_1 = arith.constant 0 : i32
    %c0_i32_2 = arith.constant 0 : i32
    return %c0_i32, %c0_i32_0, %c0_i32_1 : i32, i32, i32
  }
  func.func @transform_4(%arg0: i32) -> (i32, i32) {
    %c0_i32 = arith.constant 0 : i32
    %c0_i32_0 = arith.constant 0 : i32
    %c0_i32_1 = arith.constant 0 : i32
    return %c0_i32, %c0_i32_0 : i32, i32
  }
  func.func @transform_5(%arg0: i32) -> (i32, i32) {
    %c0_i32 = arith.constant 0 : i32
    %c0_i32_0 = arith.constant 0 : i32
    %c0_i32_1 = arith.constant 0 : i32
    return %c0_i32, %c0_i32_0 : i32, i32
  }
  func.func @transform_6(%arg0: i32) -> (i32, i32, i32) {
    %c0_i32 = arith.constant 0 : i32
    %c0_i32_0 = arith.constant 0 : i32
    %c0_i32_1 = arith.constant 0 : i32
    %c0_i32_2 = arith.constant 0 : i32
    return %c0_i32, %c0_i32_0, %c0_i32_1 : i32, i32, i32
  }
  func.func @transform_7(%arg0: i32) -> (i32, i32) {
    %c0_i32 = arith.constant 0 : i32
    %c0_i32_0 = arith.constant 0 : i32
    %c0_i32_1 = arith.constant 0 : i32
    return %c0_i32, %c0_i32_0 : i32, i32
  }
  func.func @transform_8(%arg0: i32) -> (i32, i32) {
    %c0_i32 = arith.constant 0 : i32
    %c0_i32_0 = arith.constant 0 : i32
    %c0_i32_1 = arith.constant 0 : i32
    return %c0_i32, %c0_i32_0 : i32, i32
  }
  func.func @transform_9(%arg0: i32) -> (i32, i32) {
    %c0_i32 = arith.constant 0 : i32
    %c0_i32_0 = arith.constant 0 : i32
    %c0_i32_1 = arith.constant 0 : i32
    return %c0_i32, %c0_i32_0 : i32, i32
  }
  func.func @transform_10(%arg0: i32) -> (i32, i32) {
    %c0_i32 = arith.constant 0 : i32
    %c0_i32_0 = arith.constant 0 : i32
    return %arg0, %c0_i32 : i32, i32
  }
}

</mosaic_0001>

<bundles_post_ra>
// kernel: dqn_forward.1
= control target key start
LH: loop header
LB: loop body
LE: loop exit
PB: predicated region body
PF: predicated region fallthrough
CT: control target
= control target key end

     0   :  { %s5072_s0 = inlined_call_operand.vmem [shape: bf16[128,256], index: 0, kind: input, shape index: {}]   ;;  %s5073_s1 = inlined_call_operand.vmem [shape: bf16[256,16], index: 1, kind: input, shape index: {}]   ;;  %s5074_s2 = inlined_call_operand.vmem [shape: f32[1,16], index: 2, kind: input, shape index: {}]   ;;  %s5075_s3 = inlined_call_operand.vmem [shape: bf16[16,32,128], index: 3, kind: input, shape index: {}]   ;;  %s5076_s4 = inlined_call_operand.vmem [shape: bf16[256,32], index: 4, kind: input, shape index: {}]   ;;  %s5077_s5 = inlined_call_operand.vmem [shape: f32[1,32], index: 5, kind: input, shape index: {}]   ;;  %s5078_s6 = inlined_call_operand.vmem [shape: bf16[16,32,64], index: 6, kind: input, shape index: {}]   ;;  %s5079_s7 = inlined_call_operand.vmem [shape: f32[1,64], index: 7, kind: input, shape index: {}]   ;;  %s5080_s8 = inlined_call_operand.vmem [shape: bf16[64,6], index: 8, kind: input, shape index: {}]   ;;  %s5081_s9 = inlined_call_operand.vmem [shape: f32[1,6], index: 9, kind: input, shape index: {}]   ;;  %s5082_s10 = inlined_call_operand.hbm [shape: f32[2,6], index: 10, kind: output, shape index: {}]  }
   0x1   :  { %v3953_v0 = vld [vmem:[%s5073_s1 + $0x40] sm:$0xff]   ;;  %v3955_v2 = vld [vmem:[%s5073_s1 + $0x48] sm:$0xff]   ;;  %v3957_v4 = vld [vmem:[%s5073_s1 + $0x50] sm:$0xff]  }
   0x2   :  { %v3954_v1 = vld [vmem:[%s5073_s1] sm:$0xff]   ;;  %3178 = vmatprep.subr.bf16.mxu0 %v3953_v0  ;;  %v3956_v3 = vld [vmem:[%s5073_s1 + $0x8] sm:$0xff]   ;;  %v3958_v5 = vld [vmem:[%s5073_s1 + $0x10] sm:$0xff]  }
   0x3   :  { %3179 = vmatpush3.bf16.msra.mxu0 %v3954_v1  ;;  %v3959_v6 = vld [vmem:[%s5073_s1 + $0x58] sm:$0xff]   ;;  %v3961_v8 = vld [vmem:[%s5073_s1 + $0x60] sm:$0xff]   ;;  %v3963_v10 = vld [vmem:[%s5073_s1 + $0x68] sm:$0xff]  }
   0x4   :  { %3180 = vmatprep.subr.bf16.mxu0 %v3955_v2  ;;  %v3960_v7 = vld [vmem:[%s5073_s1 + $0x18] sm:$0xff]   ;;  %v3962_v9 = vld [vmem:[%s5073_s1 + $0x20] sm:$0xff]   ;;  %v3964_v12 = vld [vmem:[%s5073_s1 + $0x28] sm:$0xff]  }
   0x5   :  { %v3971_v11 = vld [vmem:[%s5072_s0 + $0x4] ss:$8 sps:$4 sm:$0xff]   ;;  %v3965_v13 = vld [vmem:[%s5073_s1 + $0x70] sm:$0xff]   ;;  %v3967_v15 = vld [vmem:[%s5073_s1 + $0x78] sm:$0xff]  }
   0x6   :  { %300 = vmatprep.mubr.bf16.mxu0 %v3971_v11  ;;  %v3966_v14 = vld [vmem:[%s5073_s1 + $0x30] sm:$0xff]   ;;  %v3968_v16 = vld [vmem:[%s5073_s1 + $0x38] sm:$0xff]   ;;  %v3969_v17 = vld [vmem:[%s5072_s0] ss:$8 sps:$4 sm:$0xff]  }
   0x7   :  { %3181 = vmatpush3.bf16.msra.mxu0 %v3956_v3  ;;  %v3972_v18 = vld [vmem:[%s5072_s0 + $0x14] ss:$8 sps:$4 sm:$0xff]   ;;  %v3974_v19 = vld [vmem:[%s5072_s0 + $0x10] ss:$8 sps:$4 sm:$0xff]   ;;  %v3975_v20 = vld [vmem:[%s5072_s0 + $0x24] ss:$8 sps:$4 sm:$0xff]  }
   0x8   :  { %3182 = vmatprep.subr.bf16.mxu0 %v3957_v4  ;;  %v3977_v21 = vld [vmem:[%s5072_s0 + $0x20] ss:$8 sps:$4 sm:$0xff]   ;;  %v3978_v22 = vld [vmem:[%s5072_s0 + $0x34] ss:$8 sps:$4 sm:$0xff]   ;;  %v3980_v23 = vld [vmem:[%s5072_s0 + $0x30] ss:$8 sps:$4 sm:$0xff]  }
   0x9   :  { %v3981_v24 = vld [vmem:[%s5072_s0 + $0x44] ss:$8 sps:$4 sm:$0xff]   ;;  %v3983_v25 = vld [vmem:[%s5072_s0 + $0x40] ss:$8 sps:$4 sm:$0xff]   ;;  %v3984_v26 = vld [vmem:[%s5072_s0 + $0x54] ss:$8 sps:$4 sm:$0xff]  }
   0xa   :  { %v3986_v27 = vld [vmem:[%s5072_s0 + $0x50] ss:$8 sps:$4 sm:$0xff]   ;;  %v3987_v28 = vld [vmem:[%s5072_s0 + $0x64] ss:$8 sps:$4 sm:$0xff]   ;;  %v3989_v29 = vld [vmem:[%s5072_s0 + $0x60] ss:$8 sps:$4 sm:$0xff]  }
   0xb   :  { %3183 = vmatpush3.bf16.msra.mxu0 %v3958_v5  ;;  %v3990_v30 = vld [vmem:[%s5072_s0 + $0x74] ss:$8 sps:$4 sm:$0xff]  }
   0xc   :  { %3184 = vmatprep.subr.bf16.mxu0 %v3959_v6 }
   0xf   :  { %3185 = vmatpush3.bf16.msra.mxu0 %v3960_v7 }
  0x10   :  { %3186 = vmatprep.subr.bf16.mxu0 %v3961_v8 }
  0x13   :  { %3187 = vmatpush3.bf16.msra.mxu0 %v3962_v9 }
  0x14   :  { %3188 = vmatprep.subr.bf16.mxu0 %v3963_v10 }
  0x17   :  { %3189 = vmatpush3.bf16.msra.mxu0 %v3964_v12 }
  0x18   :  { %3190 = vmatprep.subr.bf16.mxu0 %v3965_v13 }
  0x1b   :  { %3191 = vmatpush3.bf16.msra.mxu0 %v3966_v14 }
  0x1c   :  { %3192 = vmatprep.subr.bf16.mxu0 %v3967_v15 }
  0x1f   :  { %3193 = vmatpush3.bf16.msra.mxu0 %v3968_v16 }
  0x22   :  { %301 = vmatmul.mubr.bf16.vlgmr.msra.gmra.mrb[0].mxu0 %v3969_v17 }
  0x23   :  { %308 = vmatprep.mubr.bf16.mxu0 %v3972_v18 }
  0x2a   :  { %309 = vmatmul.mubr.bf16.gmra.mrb[4].mxu0 %v3974_v19 }
  0x2b   :  { %316 = vmatprep.mubr.bf16.mxu0 %v3975_v20 }
  0x32   :  { %317 = vmatmul.mubr.bf16.gmra.mrb[8].mxu0 %v3977_v21 }
  0x33   :  { %324 = vmatprep.mubr.bf16.mxu0 %v3978_v22 }
  0x3a   :  { %325 = vmatmul.mubr.bf16.gmra.mrb[12].mxu0 %v3980_v23 }
  0x3b   :  { %332 = vmatprep.mubr.bf16.mxu0 %v3981_v24 }
  0x42   :  { %333 = vmatmul.mubr.bf16.gmra.mrb[16].mxu0 %v3983_v25 }
  0x43   :  { %340 = vmatprep.mubr.bf16.mxu0 %v3984_v26 }
  0x4a   :  { %341 = vmatmul.mubr.bf16.gmra.mrb[20].mxu0 %v3986_v27 }
  0x4b   :  { %348 = vmatprep.mubr.bf16.mxu0 %v3987_v28 }
  0x52   :  { %349 = vmatmul.mubr.bf16.gmra.mrb[24].mxu0 %v3989_v29 }
  0x53   :  { %15 = vsyncpa [#allocation4], 0  ;;  %356 = vmatprep.mubr.bf16.mxu0 %v3990_v30  ;;  %v3992_v31 = vld [vmem:[%s5072_s0 + $0x70] ss:$8 sps:$4 sm:$0xff]   ;;  %v3993_v32 = vld [vmem:[%s5075_s3] sm:$0xff]   ;;  %vm456_vm0 = vcmask 130048  }
  0x54   :  { %v3995_v33 = vld [vmem:[%s5075_s3 + $0x20] sm:$0xff]   ;;  %3499 = vmatprep.mubr.bf16.mxu1 %v3993_v32  ;;  %s4101_s27 = smov 32   ;;  %s4102_s12 = smov 16   ;;  %vm535_vm1 = vcmask 261248   ;;  %vm614_vm2 = vcmask 392448   ;;  %vm693_vm3 = vcmask 523648  }
  0x55   :  { %v4271_v35 = vld [vmem:[%s5074_s2] ss:$0 sm:$0xff]  ;;  %s4103_s13 = smov 64   ;;  %s4105_s15 = smov 80   ;;  %vm772_vm4 = vcmask 654848   ;;  %vm851_vm5 = vcmask 786048  }
  0x56   :  { %s4106_s16 = smov 96   ;;  %s4107_s17 = smov 112   ;;  %vm930_vm6 = vcmask 917248   ;;  %vm1009_vm7 = vcmask 1048448   ;;  %vm4109_vm8 = vmmov 0   ;;  %vm1845_vm9 = vcmask 261120  }
  0x57   :  { %vm2861_vm10 = vcmask 523264   ;;  %s4110_s30 = smov [#allocation3]   ;;  %vm2905_vm11 = vcmask 41984  }
  0x58   :  { %s2913_s11 = sshll.u32 %s4110_s30, 4  ;;  %s2914_s11 = int_to_ptr.vmem [resolvable:$true] %s2913_s11 }
  0x59   :  { %p4082_p1 = scmp.lt.s32.totalorder %s2914_s11, %s2914_s11 }
  0x5a   :  { %357 = vmatmul.mubr.bf16.gmra.mrb[28].mxu0 %v3992_v31 }
  0x5b   :  { %3539 = vmatprep.mubr.bf16.mxu0 %v3995_v33 }
  0xf5   :  { %v3194_v34 = vpop.f32.mrb[0].mxu0 }
  0xf6   :  { %v3195_v36 = vpop.f32.mrb[1].mxu0 }
  0xf7   :  { %v3196_v37 = vadd.f32 %v3195_v36, %v3194_v34  ;;  %v3197_v38 = vpop.f32.mrb[2].mxu0 }
  0xf8   :  { %v3198_v39 = vpop.f32.mrb[3].mxu0 }
  0xf9   :  { %v303_v40 = vadd.f32 %v3196_v37, %v4271_v35  ;;  %v3199_v41 = vadd.f32 %v3198_v39, %v3197_v38 }
  0xfb   :  { %v306_v42 = vadd.f32 %v3199_v41, %v4271_v35  ;;  %v365_v43 = vmax.f32 %v303_v40, 0.0 }
  0xfd   :  { %v366_v44 = vmax.f32 %v306_v42, 0.0  ;;  %v3200_v45 = vpop.f32.mrb[4].mxu0 }
  0xfe   :  { %v3201_v46 = vpop.f32.mrb[5].mxu0 }
  0xff   :  { %v4275_v47 = vpack.c.bf16 %v366_v44, %v365_v43  ;;  %v3202_v48 = vadd.f32 %v3201_v46, %v3200_v45  ;;  %v3203_v49 = vpop.f32.mrb[6].mxu0 }
 0x100   :  { %v3204_v50 = vpop.f32.mrb[7].mxu0 }
 0x101   :  { %v311_v51 = vadd.f32 %v3202_v48, %v4271_v35  ;;  %v3205_v52 = vadd.f32 %v3204_v50, %v3203_v49  ;;  %3483 = vmatprep.subr.bf16.mxu1 %v4275_v47  ;;  %3523 = vmatprep.subr.bf16.mxu0 %v4275_v47 }
 0x102   :  { %3484 = vmatpush3.bf16.msra.mxu1 %v4275_v47  ;;  %3524 = vmatpush3.bf16.msra.mxu0 %v4275_v47 }
 0x103   :  { %v314_v53 = vadd.f32 %v3205_v52, %v4271_v35  ;;  %v367_v54 = vmax.f32 %v311_v51, 0.0 }
 0x105   :  { %v368_v55 = vmax.f32 %v314_v53, 0.0  ;;  %v3206_v56 = vpop.f32.mrb[8].mxu0 }
 0x106   :  { %v3207_v57 = vpop.f32.mrb[9].mxu0 }
 0x107   :  { %v4283_v58 = vpack.c.bf16 %v368_v55, %v367_v54  ;;  %v3208_v59 = vadd.f32 %v3207_v57, %v3206_v56  ;;  %v3209_v60 = vpop.f32.mrb[10].mxu0 }
 0x108   :  { %v3210_v61 = vpop.f32.mrb[11].mxu0 }
 0x109   :  { %v319_v62 = vadd.f32 %v3208_v59, %v4271_v35  ;;  %v3211_v63 = vadd.f32 %v3210_v61, %v3209_v60  ;;  %3485 = vmatprep.subr.bf16.mxu1 %v4283_v58  ;;  %3525 = vmatprep.subr.bf16.mxu0 %v4283_v58 }
 0x10a   :  { %3486 = vmatpush3.bf16.msra.mxu1 %v4283_v58  ;;  %3526 = vmatpush3.bf16.msra.mxu0 %v4283_v58 }
 0x10b   :  { %v322_v0 = vadd.f32 %v3211_v63, %v4271_v35  ;;  %v369_v1 = vmax.f32 %v319_v62, 0.0  ;;  %v3994_v62 = vld [vmem:[%s5075_s3 + $0x8] sm:$0xff]  }
 0x10c   :  { %v3996_v63 = vld [vmem:[%s5075_s3 + $0x28] sm:$0xff]  }
 0x10d   :  { %v370_v2 = vmax.f32 %v322_v0, 0.0  ;;  %v3212_v3 = vpop.f32.mrb[12].mxu0  ;;  %v3999_v0 = vld [vmem:[%s5075_s3 + $0x40] sm:$0xff]  }
 0x10e   :  { %v3213_v4 = vpop.f32.mrb[13].mxu0 }
 0x10f   :  { %v4291_v5 = vpack.c.bf16 %v370_v2, %v369_v1  ;;  %v3214_v6 = vadd.f32 %v3213_v4, %v3212_v3  ;;  %v3215_v7 = vpop.f32.mrb[14].mxu0  ;;  %v3998_v1 = vld [vmem:[%s5075_s3 + $0x18] sm:$0xff]   ;;  %v4000_v2 = vld [vmem:[%s5075_s3 + $0x48] sm:$0xff]   ;;  %v4001_v3 = vld [vmem:[%s5075_s3 + $0x30] sm:$0xff]  }
 0x110   :  { %v3216_v8 = vpop.f32.mrb[15].mxu0  ;;  %v4003_v4 = vld [vmem:[%s5075_s3 + $0x60] sm:$0xff]  }
 0x111   :  { %v327_v9 = vadd.f32 %v3214_v6, %v4271_v35  ;;  %v3217_v10 = vadd.f32 %v3216_v8, %v3215_v7  ;;  %3487 = vmatprep.subr.bf16.mxu1 %v4291_v5  ;;  %3527 = vmatprep.subr.bf16.mxu0 %v4291_v5  ;;  %v4002_v6 = vld [vmem:[%s5075_s3 + $0x38] sm:$0xff]   ;;  %v4004_v7 = vld [vmem:[%s5075_s3 + $0x68] sm:$0xff]   ;;  %v4005_v8 = vld [vmem:[%s5075_s3 + $0x50] sm:$0xff]  }
 0x112   :  { %3488 = vmatpush3.bf16.msra.mxu1 %v4291_v5  ;;  %3528 = vmatpush3.bf16.msra.mxu0 %v4291_v5 }
 0x113   :  { %v330_v11 = vadd.f32 %v3217_v10, %v4271_v35  ;;  %v371_v12 = vmax.f32 %v327_v9, 0.0  ;;  %v4007_v9 = vld [vmem:[%s5075_s3 + $0x80] sm:$0xff]   ;;  %v4006_v10 = vld [vmem:[%s5075_s3 + $0x58] sm:$0xff]  }
 0x115   :  { %v372_v13 = vmax.f32 %v330_v11, 0.0  ;;  %v3218_v14 = vpop.f32.mrb[16].mxu0  ;;  %v4008_v11 = vld [vmem:[%s5075_s3 + $0x88] sm:$0xff]  }
 0x116   :  { %v3219_v15 = vpop.f32.mrb[17].mxu0 }
 0x117   :  { %v4299_v16 = vpack.c.bf16 %v372_v13, %v371_v12  ;;  %v3220_v17 = vadd.f32 %v3219_v15, %v3218_v14  ;;  %v3221_v18 = vpop.f32.mrb[18].mxu0  ;;  %v4009_v12 = vld [vmem:[%s5075_s3 + $0x70] sm:$0xff]   ;;  %v4010_v13 = vld [vmem:[%s5075_s3 + $0xa0] sm:$0xff]   ;;  %v4011_v14 = vld [vmem:[%s5075_s3 + $0x78] sm:$0xff]  }
 0x118   :  { %v3222_v19 = vpop.f32.mrb[19].mxu0  ;;  %v4012_v15 = vld [vmem:[%s5075_s3 + $0xa8] sm:$0xff]  }
 0x119   :  { %v335_v20 = vadd.f32 %v3220_v17, %v4271_v35  ;;  %v3223_v21 = vadd.f32 %v3222_v19, %v3221_v18  ;;  %3489 = vmatprep.subr.bf16.mxu1 %v4299_v16  ;;  %3529 = vmatprep.subr.bf16.mxu0 %v4299_v16  ;;  %v4013_v17 = vld [vmem:[%s5075_s3 + $0x90] sm:$0xff]   ;;  %v4015_v18 = vld [vmem:[%s5075_s3 + $0xc0] sm:$0xff]   ;;  %v4014_v19 = vld [vmem:[%s5075_s3 + $0x98] sm:$0xff]  }
 0x11a   :  { %3490 = vmatpush3.bf16.msra.mxu1 %v4299_v16  ;;  %3530 = vmatpush3.bf16.msra.mxu0 %v4299_v16 }
 0x11b   :  { %v338_v22 = vadd.f32 %v3223_v21, %v4271_v35  ;;  %v373_v23 = vmax.f32 %v335_v20, 0.0  ;;  %v4016_v20 = vld [vmem:[%s5075_s3 + $0xc8] sm:$0xff]   ;;  %v4017_v21 = vld [vmem:[%s5075_s3 + $0xb0] sm:$0xff]  }
 0x11d   :  { %v374_v24 = vmax.f32 %v338_v22, 0.0  ;;  %v3224_v25 = vpop.f32.mrb[20].mxu0  ;;  %v4019_v22 = vld [vmem:[%s5075_s3 + $0xe0] sm:$0xff]  }
 0x11e   :  { %v3225_v26 = vpop.f32.mrb[21].mxu0 }
 0x11f   :  { %v4307_v27 = vpack.c.bf16 %v374_v24, %v373_v23  ;;  %v3226_v28 = vadd.f32 %v3225_v26, %v3224_v25  ;;  %v3227_v29 = vpop.f32.mrb[22].mxu0  ;;  %v4018_v23 = vld [vmem:[%s5075_s3 + $0xb8] sm:$0xff]   ;;  %v4020_v24 = vld [vmem:[%s5075_s3 + $0xe8] sm:$0xff]   ;;  %v4021_v25 = vld [vmem:[%s5075_s3 + $0xd0] sm:$0xff]  }
 0x120   :  { %v3228_v30 = vpop.f32.mrb[23].mxu0 }
 0x121   :  { %v343_v31 = vadd.f32 %v3226_v28, %v4271_v35  ;;  %v3229_v32 = vadd.f32 %v3228_v30, %v3227_v29  ;;  %3491 = vmatprep.subr.bf16.mxu1 %v4307_v27  ;;  %3531 = vmatprep.subr.bf16.mxu0 %v4307_v27 }
 0x122   :  { %3492 = vmatpush3.bf16.msra.mxu1 %v4307_v27  ;;  %3532 = vmatpush3.bf16.msra.mxu0 %v4307_v27 }
 0x123   :  { %v346_v33 = vadd.f32 %v3229_v32, %v4271_v35  ;;  %v375_v34 = vmax.f32 %v343_v31, 0.0 }
 0x125   :  { %v376_v36 = vmax.f32 %v346_v33, 0.0  ;;  %v3230_v37 = vpop.f32.mrb[24].mxu0 }
 0x126   :  { %v3231_v38 = vpop.f32.mrb[25].mxu0 }
 0x127   :  { %v4315_v39 = vpack.c.bf16 %v376_v36, %v375_v34  ;;  %v3232_v40 = vadd.f32 %v3231_v38, %v3230_v37  ;;  %v3233_v41 = vpop.f32.mrb[26].mxu0 }
 0x128   :  { %v3234_v42 = vpop.f32.mrb[27].mxu0 }
 0x129   :  { %v351_v43 = vadd.f32 %v3232_v40, %v4271_v35  ;;  %v3235_v44 = vadd.f32 %v3234_v42, %v3233_v41  ;;  %3493 = vmatprep.subr.bf16.mxu1 %v4315_v39  ;;  %3533 = vmatprep.subr.bf16.mxu0 %v4315_v39  ;;  %v4022_v41 = vld [vmem:[%s5075_s3 + $0xd8] sm:$0xff]   ;;  %v4023_v42 = vld [vmem:[%s5075_s3 + $0xf0] sm:$0xff]  }
 0x12a   :  { %3494 = vmatpush3.bf16.msra.mxu1 %v4315_v39  ;;  %3534 = vmatpush3.bf16.msra.mxu0 %v4315_v39 }
 0x12b   :  { %v354_v45 = vadd.f32 %v3235_v44, %v4271_v35  ;;  %v377_v46 = vmax.f32 %v351_v43, 0.0 }
 0x12d   :  { %v378_v48 = vmax.f32 %v354_v45, 0.0  ;;  %v3236_v49 = vpop.f32.mrb[28].mxu0 }
 0x12e   :  { %v3237_v50 = vpop.f32.mrb[29].mxu0 }
 0x12f   :  { %v4323_v51 = vpack.c.bf16 %v378_v48, %v377_v46  ;;  %v3238_v52 = vadd.f32 %v3237_v50, %v3236_v49  ;;  %v3239_v53 = vpop.f32.mrb[30].mxu0 }
 0x130   :  { %v3240_v54 = vpop.f32.mrb[31].mxu0 }
 0x131   :  { %v359_v55 = vadd.f32 %v3238_v52, %v4271_v35  ;;  %v3241_v56 = vadd.f32 %v3240_v54, %v3239_v53  ;;  %3495 = vmatprep.subr.bf16.mxu1 %v4323_v51  ;;  %3535 = vmatprep.subr.bf16.mxu0 %v4323_v51 }
 0x132   :  { %3496 = vmatpush3.bf16.msra.mxu1 %v4323_v51  ;;  %3536 = vmatpush3.bf16.msra.mxu0 %v4323_v51 }
 0x133   :  { %v362_v57 = vadd.f32 %v3241_v56, %v4271_v35  ;;  %v379_v59 = vmax.f32 %v359_v55, 0.0  ;;  %v3997_v35 = vld [vmem:[%s5075_s3 + $0x10] sm:$0xff]  }
 0x135   :  { %v380_v60 = vmax.f32 %v362_v57, 0.0 }
 0x137   :  { %v4331_v61 = vpack.c.bf16 %v380_v60, %v379_v59 }
 0x139   :  { %3497 = vmatprep.subr.bf16.mxu1 %v4331_v61  ;;  %3537 = vmatprep.subr.bf16.mxu0 %v4331_v61 }
 0x13a   :  { %3498 = vmatpush3.bf16.msra.mxu1 %v4331_v61  ;;  %3538 = vmatpush3.bf16.msra.mxu0 %v4331_v61 }
 0x13b   :  { %3503 = vmatprep.subr.bf16.mxu1 %v4275_v47  ;;  %3563 = vmatprep.subr.bf16.mxu0 %v4275_v47 }
 0x13d   :  { %3500 = vmatmul.mubr.bf16.vlgmr.msra.gmra.mrb[0].mxu1 %v3994_v62  ;;  %3540 = vmatmul.mubr.bf16.vlgmr.msra.gmra.mrb[32].mxu0 %v3996_v63 }
 0x13e   :  { %3504 = vmatpush3.bf16.msra.mxu1 %v4275_v47  ;;  %3564 = vmatpush3.bf16.msra.mxu0 %v4275_v47 }
 0x13f   :  { %3505 = vmatprep.subr.bf16.mxu1 %v4283_v58  ;;  %3565 = vmatprep.subr.bf16.mxu0 %v4283_v58 }
 0x140   :  { %3519 = vmatprep.mubr.bf16.mxu1 %v3997_v35  ;;  %3579 = vmatprep.mubr.bf16.mxu0 %v3999_v0 }
 0x142   :  { %3506 = vmatpush3.bf16.msra.mxu1 %v4283_v58  ;;  %3566 = vmatpush3.bf16.msra.mxu0 %v4283_v58 }
 0x143   :  { %3507 = vmatprep.subr.bf16.mxu1 %v4291_v5  ;;  %3567 = vmatprep.subr.bf16.mxu0 %v4291_v5 }
 0x146   :  { %3508 = vmatpush3.bf16.msra.mxu1 %v4291_v5  ;;  %3568 = vmatpush3.bf16.msra.mxu0 %v4291_v5 }
 0x147   :  { %3509 = vmatprep.subr.bf16.mxu1 %v4299_v16  ;;  %3569 = vmatprep.subr.bf16.mxu0 %v4299_v16 }
 0x14a   :  { %3510 = vmatpush3.bf16.msra.mxu1 %v4299_v16  ;;  %3570 = vmatpush3.bf16.msra.mxu0 %v4299_v16 }
 0x14b   :  { %3511 = vmatprep.subr.bf16.mxu1 %v4307_v27  ;;  %3571 = vmatprep.subr.bf16.mxu0 %v4307_v27 }
 0x14e   :  { %3512 = vmatpush3.bf16.msra.mxu1 %v4307_v27  ;;  %3572 = vmatpush3.bf16.msra.mxu0 %v4307_v27 }
 0x14f   :  { %3513 = vmatprep.subr.bf16.mxu1 %v4315_v39  ;;  %3573 = vmatprep.subr.bf16.mxu0 %v4315_v39 }
 0x152   :  { %3514 = vmatpush3.bf16.msra.mxu1 %v4315_v39  ;;  %3574 = vmatpush3.bf16.msra.mxu0 %v4315_v39 }
 0x153   :  { %3515 = vmatprep.subr.bf16.mxu1 %v4323_v51  ;;  %3575 = vmatprep.subr.bf16.mxu0 %v4323_v51 }
 0x156   :  { %3516 = vmatpush3.bf16.msra.mxu1 %v4323_v51  ;;  %3576 = vmatpush3.bf16.msra.mxu0 %v4323_v51 }
 0x157   :  { %3517 = vmatprep.subr.bf16.mxu1 %v4331_v61  ;;  %3577 = vmatprep.subr.bf16.mxu0 %v4331_v61 }
 0x15a   :  { %3518 = vmatpush3.bf16.msra.mxu1 %v4331_v61  ;;  %3578 = vmatpush3.bf16.msra.mxu0 %v4331_v61 }
 0x15b   :  { %3543 = vmatprep.subr.bf16.mxu1 %v4275_v47  ;;  %3603 = vmatprep.subr.bf16.mxu0 %v4275_v47 }
 0x15d   :  { %3520 = vmatmul.mubr.bf16.vlgmr.msra.gmra.mrb[4].mxu1 %v3998_v1  ;;  %3580 = vmatmul.mubr.bf16.vlgmr.msra.gmra.mrb[36].mxu0 %v4000_v2 }
 0x15e   :  { %3544 = vmatpush3.bf16.msra.mxu1 %v4275_v47  ;;  %3604 = vmatpush3.bf16.msra.mxu0 %v4275_v47 }
 0x15f   :  { %3545 = vmatprep.subr.bf16.mxu1 %v4283_v58  ;;  %3605 = vmatprep.subr.bf16.mxu0 %v4283_v58 }
 0x160   :  { %3559 = vmatprep.mubr.bf16.mxu1 %v4001_v3  ;;  %3619 = vmatprep.mubr.bf16.mxu0 %v4003_v4 }
 0x162   :  { %3546 = vmatpush3.bf16.msra.mxu1 %v4283_v58  ;;  %3606 = vmatpush3.bf16.msra.mxu0 %v4283_v58 }
 0x163   :  { %3547 = vmatprep.subr.bf16.mxu1 %v4291_v5  ;;  %3607 = vmatprep.subr.bf16.mxu0 %v4291_v5 }
 0x166   :  { %3548 = vmatpush3.bf16.msra.mxu1 %v4291_v5  ;;  %3608 = vmatpush3.bf16.msra.mxu0 %v4291_v5 }
 0x167   :  { %3549 = vmatprep.subr.bf16.mxu1 %v4299_v16  ;;  %3609 = vmatprep.subr.bf16.mxu0 %v4299_v16 }
 0x16a   :  { %3550 = vmatpush3.bf16.msra.mxu1 %v4299_v16  ;;  %3610 = vmatpush3.bf16.msra.mxu0 %v4299_v16 }
 0x16b   :  { %3551 = vmatprep.subr.bf16.mxu1 %v4307_v27  ;;  %3611 = vmatprep.subr.bf16.mxu0 %v4307_v27 }
 0x16e   :  { %3552 = vmatpush3.bf16.msra.mxu1 %v4307_v27  ;;  %3612 = vmatpush3.bf16.msra.mxu0 %v4307_v27 }
 0x16f   :  { %3553 = vmatprep.subr.bf16.mxu1 %v4315_v39  ;;  %3613 = vmatprep.subr.bf16.mxu0 %v4315_v39 }
 0x172   :  { %3554 = vmatpush3.bf16.msra.mxu1 %v4315_v39  ;;  %3614 = vmatpush3.bf16.msra.mxu0 %v4315_v39 }
 0x173   :  { %3555 = vmatprep.subr.bf16.mxu1 %v4323_v51  ;;  %3615 = vmatprep.subr.bf16.mxu0 %v4323_v51 }
 0x176   :  { %3556 = vmatpush3.bf16.msra.mxu1 %v4323_v51  ;;  %3616 = vmatpush3.bf16.msra.mxu0 %v4323_v51 }
 0x177   :  { %3557 = vmatprep.subr.bf16.mxu1 %v4331_v61  ;;  %3617 = vmatprep.subr.bf16.mxu0 %v4331_v61 }
 0x17a   :  { %3558 = vmatpush3.bf16.msra.mxu1 %v4331_v61  ;;  %3618 = vmatpush3.bf16.msra.mxu0 %v4331_v61 }
 0x17b   :  { %3583 = vmatprep.subr.bf16.mxu1 %v4275_v47  ;;  %3643 = vmatprep.subr.bf16.mxu0 %v4275_v47 }
 0x17d   :  { %3560 = vmatmul.mubr.bf16.vlgmr.msra.gmra.mrb[8].mxu1 %v4002_v6  ;;  %3620 = vmatmul.mubr.bf16.vlgmr.msra.gmra.mrb[40].mxu0 %v4004_v7 }
 0x17e   :  { %3584 = vmatpush3.bf16.msra.mxu1 %v4275_v47  ;;  %3644 = vmatpush3.bf16.msra.mxu0 %v4275_v47 }
 0x17f   :  { %3585 = vmatprep.subr.bf16.mxu1 %v4283_v58  ;;  %3645 = vmatprep.subr.bf16.mxu0 %v4283_v58 }
 0x180   :  { %3599 = vmatprep.mubr.bf16.mxu1 %v4005_v8  ;;  %3659 = vmatprep.mubr.bf16.mxu0 %v4007_v9 }
 0x182   :  { %3586 = vmatpush3.bf16.msra.mxu1 %v4283_v58  ;;  %3646 = vmatpush3.bf16.msra.mxu0 %v4283_v58 }
 0x183   :  { %3587 = vmatprep.subr.bf16.mxu1 %v4291_v5  ;;  %3647 = vmatprep.subr.bf16.mxu0 %v4291_v5 }
 0x186   :  { %3588 = vmatpush3.bf16.msra.mxu1 %v4291_v5  ;;  %3648 = vmatpush3.bf16.msra.mxu0 %v4291_v5 }
 0x187   :  { %3589 = vmatprep.subr.bf16.mxu1 %v4299_v16  ;;  %3649 = vmatprep.subr.bf16.mxu0 %v4299_v16 }
 0x18a   :  { %3590 = vmatpush3.bf16.msra.mxu1 %v4299_v16  ;;  %3650 = vmatpush3.bf16.msra.mxu0 %v4299_v16 }
 0x18b   :  { %3591 = vmatprep.subr.bf16.mxu1 %v4307_v27  ;;  %3651 = vmatprep.subr.bf16.mxu0 %v4307_v27 }
 0x18e   :  { %3592 = vmatpush3.bf16.msra.mxu1 %v4307_v27  ;;  %3652 = vmatpush3.bf16.msra.mxu0 %v4307_v27 }
 0x18f   :  { %3593 = vmatprep.subr.bf16.mxu1 %v4315_v39  ;;  %3653 = vmatprep.subr.bf16.mxu0 %v4315_v39 }
 0x192   :  { %3594 = vmatpush3.bf16.msra.mxu1 %v4315_v39  ;;  %3654 = vmatpush3.bf16.msra.mxu0 %v4315_v39 }
 0x193   :  { %3595 = vmatprep.subr.bf16.mxu1 %v4323_v51  ;;  %3655 = vmatprep.subr.bf16.mxu0 %v4323_v51 }
 0x196   :  { %3596 = vmatpush3.bf16.msra.mxu1 %v4323_v51  ;;  %3656 = vmatpush3.bf16.msra.mxu0 %v4323_v51 }
 0x197   :  { %3597 = vmatprep.subr.bf16.mxu1 %v4331_v61  ;;  %3657 = vmatprep.subr.bf16.mxu0 %v4331_v61 }
 0x19a   :  { %3598 = vmatpush3.bf16.msra.mxu1 %v4331_v61  ;;  %3658 = vmatpush3.bf16.msra.mxu0 %v4331_v61 }
 0x19b   :  { %3623 = vmatprep.subr.bf16.mxu1 %v4275_v47  ;;  %3683 = vmatprep.subr.bf16.mxu0 %v4275_v47 }
 0x19d   :  { %3600 = vmatmul.mubr.bf16.vlgmr.msra.gmra.mrb[12].mxu1 %v4006_v10  ;;  %3660 = vmatmul.mubr.bf16.vlgmr.msra.gmra.mrb[44].mxu0 %v4008_v11 }
 0x19e   :  { %3624 = vmatpush3.bf16.msra.mxu1 %v4275_v47  ;;  %3684 = vmatpush3.bf16.msra.mxu0 %v4275_v47 }
 0x19f   :  { %3625 = vmatprep.subr.bf16.mxu1 %v4283_v58  ;;  %3685 = vmatprep.subr.bf16.mxu0 %v4283_v58 }
 0x1a0   :  { %3639 = vmatprep.mubr.bf16.mxu1 %v4009_v12  ;;  %3699 = vmatprep.mubr.bf16.mxu0 %v4010_v13 }
 0x1a2   :  { %3626 = vmatpush3.bf16.msra.mxu1 %v4283_v58  ;;  %3686 = vmatpush3.bf16.msra.mxu0 %v4283_v58 }
 0x1a3   :  { %3627 = vmatprep.subr.bf16.mxu1 %v4291_v5  ;;  %3687 = vmatprep.subr.bf16.mxu0 %v4291_v5 }
 0x1a6   :  { %3628 = vmatpush3.bf16.msra.mxu1 %v4291_v5  ;;  %3688 = vmatpush3.bf16.msra.mxu0 %v4291_v5 }
 0x1a7   :  { %3629 = vmatprep.subr.bf16.mxu1 %v4299_v16  ;;  %3689 = vmatprep.subr.bf16.mxu0 %v4299_v16 }
 0x1aa   :  { %3630 = vmatpush3.bf16.msra.mxu1 %v4299_v16  ;;  %3690 = vmatpush3.bf16.msra.mxu0 %v4299_v16 }
 0x1ab   :  { %3631 = vmatprep.subr.bf16.mxu1 %v4307_v27  ;;  %3691 = vmatprep.subr.bf16.mxu0 %v4307_v27 }
 0x1ae   :  { %3632 = vmatpush3.bf16.msra.mxu1 %v4307_v27  ;;  %3692 = vmatpush3.bf16.msra.mxu0 %v4307_v27 }
 0x1af   :  { %3633 = vmatprep.subr.bf16.mxu1 %v4315_v39  ;;  %3693 = vmatprep.subr.bf16.mxu0 %v4315_v39 }
 0x1b2   :  { %3634 = vmatpush3.bf16.msra.mxu1 %v4315_v39  ;;  %3694 = vmatpush3.bf16.msra.mxu0 %v4315_v39 }
 0x1b3   :  { %3635 = vmatprep.subr.bf16.mxu1 %v4323_v51  ;;  %3695 = vmatprep.subr.bf16.mxu0 %v4323_v51 }
 0x1b6   :  { %3636 = vmatpush3.bf16.msra.mxu1 %v4323_v51  ;;  %3696 = vmatpush3.bf16.msra.mxu0 %v4323_v51 }
 0x1b7   :  { %3637 = vmatprep.subr.bf16.mxu1 %v4331_v61  ;;  %3697 = vmatprep.subr.bf16.mxu0 %v4331_v61 }
 0x1ba   :  { %3638 = vmatpush3.bf16.msra.mxu1 %v4331_v61  ;;  %3698 = vmatpush3.bf16.msra.mxu0 %v4331_v61 }
 0x1bb   :  { %3663 = vmatprep.subr.bf16.mxu1 %v4275_v47  ;;  %3723 = vmatprep.subr.bf16.mxu0 %v4275_v47 }
 0x1bd   :  { %3640 = vmatmul.mubr.bf16.vlgmr.msra.gmra.mrb[16].mxu1 %v4011_v14  ;;  %3700 = vmatmul.mubr.bf16.vlgmr.msra.gmra.mrb[48].mxu0 %v4012_v15 }
 0x1be   :  { %3664 = vmatpush3.bf16.msra.mxu1 %v4275_v47  ;;  %3724 = vmatpush3.bf16.msra.mxu0 %v4275_v47 }
 0x1bf   :  { %3665 = vmatprep.subr.bf16.mxu1 %v4283_v58  ;;  %3725 = vmatprep.subr.bf16.mxu0 %v4283_v58 }
 0x1c0   :  { %3679 = vmatprep.mubr.bf16.mxu1 %v4013_v17  ;;  %3739 = vmatprep.mubr.bf16.mxu0 %v4015_v18 }
 0x1c2   :  { %3666 = vmatpush3.bf16.msra.mxu1 %v4283_v58  ;;  %3726 = vmatpush3.bf16.msra.mxu0 %v4283_v58 }
 0x1c3   :  { %3667 = vmatprep.subr.bf16.mxu1 %v4291_v5  ;;  %3727 = vmatprep.subr.bf16.mxu0 %v4291_v5 }
 0x1c6   :  { %3668 = vmatpush3.bf16.msra.mxu1 %v4291_v5  ;;  %3728 = vmatpush3.bf16.msra.mxu0 %v4291_v5 }
 0x1c7   :  { %3669 = vmatprep.subr.bf16.mxu1 %v4299_v16  ;;  %3729 = vmatprep.subr.bf16.mxu0 %v4299_v16 }
 0x1ca   :  { %3670 = vmatpush3.bf16.msra.mxu1 %v4299_v16  ;;  %3730 = vmatpush3.bf16.msra.mxu0 %v4299_v16 }
 0x1cb   :  { %3671 = vmatprep.subr.bf16.mxu1 %v4307_v27  ;;  %3731 = vmatprep.subr.bf16.mxu0 %v4307_v27 }
 0x1ce   :  { %3672 = vmatpush3.bf16.msra.mxu1 %v4307_v27  ;;  %3732 = vmatpush3.bf16.msra.mxu0 %v4307_v27 }
 0x1cf   :  { %3673 = vmatprep.subr.bf16.mxu1 %v4315_v39  ;;  %3733 = vmatprep.subr.bf16.mxu0 %v4315_v39 }
 0x1d2   :  { %3674 = vmatpush3.bf16.msra.mxu1 %v4315_v39  ;;  %3734 = vmatpush3.bf16.msra.mxu0 %v4315_v39 }
 0x1d3   :  { %3675 = vmatprep.subr.bf16.mxu1 %v4323_v51  ;;  %3735 = vmatprep.subr.bf16.mxu0 %v4323_v51 }
 0x1d6   :  { %3676 = vmatpush3.bf16.msra.mxu1 %v4323_v51  ;;  %3736 = vmatpush3.bf16.msra.mxu0 %v4323_v51 }
 0x1d7   :  { %3677 = vmatprep.subr.bf16.mxu1 %v4331_v61  ;;  %3737 = vmatprep.subr.bf16.mxu0 %v4331_v61 }
 0x1da   :  { %3678 = vmatpush3.bf16.msra.mxu1 %v4331_v61  ;;  %3738 = vmatpush3.bf16.msra.mxu0 %v4331_v61 }
 0x1db   :  { %3703 = vmatprep.subr.bf16.mxu1 %v4275_v47  ;;  %3763 = vmatprep.subr.bf16.mxu0 %v4275_v47 }
 0x1dd   :  { %3680 = vmatmul.mubr.bf16.vlgmr.msra.gmra.mrb[20].mxu1 %v4014_v19  ;;  %3740 = vmatmul.mubr.bf16.vlgmr.msra.gmra.mrb[52].mxu0 %v4016_v20 }
 0x1de   :  { %3704 = vmatpush3.bf16.msra.mxu1 %v4275_v47  ;;  %3764 = vmatpush3.bf16.msra.mxu0 %v4275_v47 }
 0x1df   :  { %3705 = vmatprep.subr.bf16.mxu1 %v4283_v58  ;;  %3765 = vmatprep.subr.bf16.mxu0 %v4283_v58 }
 0x1e0   :  { %3719 = vmatprep.mubr.bf16.mxu1 %v4017_v21  ;;  %3779 = vmatprep.mubr.bf16.mxu0 %v4019_v22 }
 0x1e2   :  { %3706 = vmatpush3.bf16.msra.mxu1 %v4283_v58  ;;  %3766 = vmatpush3.bf16.msra.mxu0 %v4283_v58 }
 0x1e3   :  { %3707 = vmatprep.subr.bf16.mxu1 %v4291_v5  ;;  %3767 = vmatprep.subr.bf16.mxu0 %v4291_v5 }
 0x1e6   :  { %3708 = vmatpush3.bf16.msra.mxu1 %v4291_v5  ;;  %3768 = vmatpush3.bf16.msra.mxu0 %v4291_v5 }
 0x1e7   :  { %3709 = vmatprep.subr.bf16.mxu1 %v4299_v16  ;;  %3769 = vmatprep.subr.bf16.mxu0 %v4299_v16 }
 0x1ea   :  { %3710 = vmatpush3.bf16.msra.mxu1 %v4299_v16  ;;  %3770 = vmatpush3.bf16.msra.mxu0 %v4299_v16 }
 0x1eb   :  { %3711 = vmatprep.subr.bf16.mxu1 %v4307_v27  ;;  %3771 = vmatprep.subr.bf16.mxu0 %v4307_v27 }
 0x1ee   :  { %3712 = vmatpush3.bf16.msra.mxu1 %v4307_v27  ;;  %3772 = vmatpush3.bf16.msra.mxu0 %v4307_v27 }
 0x1ef   :  { %3713 = vmatprep.subr.bf16.mxu1 %v4315_v39  ;;  %3773 = vmatprep.subr.bf16.mxu0 %v4315_v39 }
 0x1f2   :  { %3714 = vmatpush3.bf16.msra.mxu1 %v4315_v39  ;;  %3774 = vmatpush3.bf16.msra.mxu0 %v4315_v39 }
 0x1f3   :  { %3715 = vmatprep.subr.bf16.mxu1 %v4323_v51  ;;  %3775 = vmatprep.subr.bf16.mxu0 %v4323_v51 }
 0x1f6   :  { %3716 = vmatpush3.bf16.msra.mxu1 %v4323_v51  ;;  %3776 = vmatpush3.bf16.msra.mxu0 %v4323_v51 }
 0x1f7   :  { %3717 = vmatprep.subr.bf16.mxu1 %v4331_v61  ;;  %3777 = vmatprep.subr.bf16.mxu0 %v4331_v61 }
 0x1fa   :  { %3718 = vmatpush3.bf16.msra.mxu1 %v4331_v61  ;;  %3778 = vmatpush3.bf16.msra.mxu0 %v4331_v61 }
 0x1fb   :  { %3743 = vmatprep.subr.bf16.mxu1 %v4275_v47 }
 0x1fd   :  { %3720 = vmatmul.mubr.bf16.vlgmr.msra.gmra.mrb[24].mxu1 %v4018_v23  ;;  %3780 = vmatmul.mubr.bf16.vlgmr.msra.gmra.mrb[56].mxu0 %v4020_v24 }
 0x1fe   :  { %3744 = vmatpush3.bf16.msra.mxu1 %v4275_v47  ;;  %3759 = vmatprep.mubr.bf16.mxu1 %v4021_v25 }
 0x1ff   :  { %3745 = vmatprep.subr.bf16.mxu1 %v4283_v58 }
 0x202   :  { %3746 = vmatpush3.bf16.msra.mxu1 %v4283_v58 }
 0x203   :  { %3747 = vmatprep.subr.bf16.mxu1 %v4291_v5 }
 0x206   :  { %3748 = vmatpush3.bf16.msra.mxu1 %v4291_v5 }
 0x207   :  { %3749 = vmatprep.subr.bf16.mxu1 %v4299_v16 }
 0x20a   :  { %3750 = vmatpush3.bf16.msra.mxu1 %v4299_v16 }
 0x20b   :  { %3751 = vmatprep.subr.bf16.mxu1 %v4307_v27 }
 0x20e   :  { %3752 = vmatpush3.bf16.msra.mxu1 %v4307_v27 }
 0x20f   :  { %3753 = vmatprep.subr.bf16.mxu1 %v4315_v39 }
 0x210   :  { %v3501_v26 = vpop.f32.mrb[0].mxu1  ;;  %v4621_v28 = vpop.f32.mrb[32].mxu0 }
 0x211   :  { %v439_v29 = vpop.f32.mrb[1].mxu1  ;;  %v589_v30 = vpop.f32.mrb[33].mxu0 }
 0x212   :  { %v3502_v31 = vpop.f32.mrb[2].mxu1  ;;  %3754 = vmatpush3.bf16.msra.mxu1 %v4315_v39  ;;  %v4624_v32 = vpop.f32.mrb[34].mxu0 }
 0x213   :  { %v455_v33 = vpack.c.bf16 %v3502_v31, %v3501_v26  ;;  %v442_v34 = vpop.f32.mrb[3].mxu1  ;;  %3755 = vmatprep.subr.bf16.mxu1 %v4323_v51  ;;  %v605_v36 = vpack.c.bf16 %v4624_v32, %v4621_v28  ;;  %v592_v37 = vpop.f32.mrb[35].mxu0 }
 0x214   :  { %v454_v38 = vpack.c.bf16 %v442_v34, %v439_v29  ;;  %v604_v40 = vpack.c.bf16 %v592_v37, %v589_v30 }
 0x215   :  { %458 = vst.msk [vmem:[#allocation2 + $0x10] sm:$0xff] %vm456_vm0, %v455_v33 }
 0x216   :  { %457 = vst.msk [vmem:[#allocation2] sm:$0xff] %vm456_vm0, %v454_v38  ;;  %3756 = vmatpush3.bf16.msra.mxu1 %v4323_v51  ;;  %608 = vrot.lane.b32.xlu1 %v604_v40, %s4101_s27 }
 0x217   :  { %3757 = vmatprep.subr.bf16.mxu1 %v4331_v61 }
 0x21a   :  { %3758 = vmatpush3.bf16.msra.mxu1 %v4331_v61 }
 0x21b   :  { %3783 = vmatprep.subr.bf16.mxu1 %v4275_v47 }
 0x21d   :  { %3760 = vmatmul.mubr.bf16.vlgmr.msra.gmra.mrb[28].mxu1 %v4022_v41 }
 0x21e   :  { %3784 = vmatpush3.bf16.msra.mxu1 %v4275_v47  ;;  %3799 = vmatprep.mubr.bf16.mxu1 %v4023_v42 }
 0x21f   :  { %3785 = vmatprep.subr.bf16.mxu1 %v4283_v58 }
 0x222   :  { %3786 = vmatpush3.bf16.msra.mxu1 %v4283_v58 }
 0x223   :  { %3787 = vmatprep.subr.bf16.mxu1 %v4291_v5 }
 0x226   :  { %3788 = vmatpush3.bf16.msra.mxu1 %v4291_v5 }
 0x227   :  { %3789 = vmatprep.subr.bf16.mxu1 %v4299_v16 }
 0x22a   :  { %3790 = vmatpush3.bf16.msra.mxu1 %v4299_v16 }
 0x22b   :  { %3791 = vmatprep.subr.bf16.mxu1 %v4307_v27 }
 0x22e   :  { %3792 = vmatpush3.bf16.msra.mxu1 %v4307_v27 }
 0x22f   :  { %3793 = vmatprep.subr.bf16.mxu1 %v4315_v39 }
 0x230   :  { %v4652_v47 = vpop.f32.mrb[4].mxu1  ;;  %v4654_v43 = vpop.f32.mrb[36].mxu0 }
 0x231   :  { %v510_v44 = vpop.f32.mrb[5].mxu1  ;;  %v747_v58 = vpop.f32.mrb[37].mxu0 }
 0x232   :  { %v4656_v45 = vpop.f32.mrb[6].mxu1  ;;  %3794 = vmatpush3.bf16.msra.mxu1 %v4315_v39  ;;  %v4659_v5 = vpop.f32.mrb[38].mxu0  ;;  %v4024_v39 = vld [vmem:[%s5075_s3 + $0xf8] sm:$0xff]   ;;  %s4104_s3 = smov 48  }
 0x233   :  { %v526_v16 = vpack.c.bf16 %v4656_v45, %v4652_v47  ;;  %v513_v46 = vpop.f32.mrb[7].mxu1  ;;  %3795 = vmatprep.subr.bf16.mxu1 %v4323_v51  ;;  %v763_v27 = vpack.c.bf16 %v4659_v5, %v4654_v43  ;;  %v750_v48 = vpop.f32.mrb[39].mxu0 }
 0x234   :  { %v525_v49 = vpack.c.bf16 %v513_v46, %v510_v44  ;;  %v762_v50 = vpack.c.bf16 %v750_v48, %v747_v58 }
 0x236   :  { %3796 = vmatpush3.bf16.msra.mxu1 %v4323_v51  ;;  %529 = vrot.lane.b32.xlu0 %v525_v49, %s4102_s12 }
 0x237   :  { %3797 = vmatprep.subr.bf16.mxu1 %v4331_v61  ;;  %766 = vrot.lane.b32.xlu1 %v762_v50, %s4103_s13 }
 0x23a   :  { %3798 = vmatpush3.bf16.msra.mxu1 %v4331_v61 }
 0x23d   :  { %3800 = vmatmul.mubr.bf16.vlgmr.msra.gmra.mrb[32].mxu1 %v4024_v39 }
 0x250   :  { %v3561_v52 = vpop.f32.mrb[8].mxu1  ;;  %v4674_v53 = vpop.f32.mrb[40].mxu0 }
 0x251   :  { %v668_v54 = vpop.f32.mrb[9].mxu1  ;;  %v905_v51 = vpop.f32.mrb[41].mxu0 }
 0x252   :  { %v3562_v55 = vpop.f32.mrb[10].mxu1  ;;  %v4676_v56 = vpop.f32.mrb[42].mxu0 }
 0x253   :  { %v684_v57 = vpack.c.bf16 %v3562_v55, %v3561_v52  ;;  %v671_v59 = vpop.f32.mrb[11].mxu1  ;;  %v921_v60 = vpack.c.bf16 %v4676_v56, %v4674_v53  ;;  %v908_v62 = vpop.f32.mrb[43].mxu0  ;;  %v4025_v53 = vld [vmem:[%s5076_s4 + $0x40] sm:$0xff]   ;;  %v4028_v55 = vld [vmem:[%s5076_s4 + $0x8] sm:$0xff]   ;;  %v4029_v56 = vld [vmem:[%s5076_s4 + $0x50] sm:$0xff]  }
 0x254   :  { %v683_v63 = vpack.c.bf16 %v671_v59, %v668_v54  ;;  %v920_v35 = vpack.c.bf16 %v908_v62, %v905_v51  ;;  %v4026_v54 = vld [vmem:[%s5076_s4] sm:$0xff]   ;;  %v4027_v51 = vld [vmem:[%s5076_s4 + $0x48] sm:$0xff]   ;;  %3402 = vmatprep.subr.bf16.mxu0 %v4025_v53 }
 0x255   :  { %3403 = vmatpush3.bf16.msra.mxu0 %v4026_v54 }
 0x256   :  { %687 = vrot.lane.b32.xlu1 %v683_v63, %s4104_s3  ;;  %3404 = vmatprep.subr.bf16.mxu0 %v4027_v51  ;;  %v4031_v63 = vld [vmem:[%s5076_s4 + $0x58] sm:$0xff]  }
 0x259   :  { %3405 = vmatpush3.bf16.msra.mxu0 %v4028_v55 }
 0x25a   :  { %3406 = vmatprep.subr.bf16.mxu0 %v4029_v56 }
 0x270   :  { %v3601_v61 = vpop.f32.mrb[12].mxu1  ;;  %v3661_v0 = vpop.f32.mrb[44].mxu0 }
 0x271   :  { %v826_v1 = vpop.f32.mrb[13].mxu1  ;;  %v1063_v2 = vpop.f32.mrb[45].mxu0 }
 0x272   :  { %v3602_v3 = vpop.f32.mrb[14].mxu1  ;;  %v3662_v4 = vpop.f32.mrb[46].mxu0 }
 0x273   :  { %v842_v6 = vpack.c.bf16 %v3602_v3, %v3601_v61  ;;  %v829_v7 = vpop.f32.mrb[15].mxu1  ;;  %v1079_v8 = vpack.c.bf16 %v3662_v4, %v3661_v0  ;;  %v1066_v9 = vpop.f32.mrb[47].mxu0  ;;  %v4034_v3 = vld [vmem:[%s5076_s4 + $0x20] sm:$0xff]   ;;  %v4035_v4 = vld [vmem:[%s5076_s4 + $0x68] sm:$0xff]  }
 0x274   :  { %v841_v10 = vpack.c.bf16 %v829_v7, %v826_v1  ;;  %v1078_v11 = vpack.c.bf16 %v1066_v9, %v1063_v2  ;;  %v4032_v1 = vld [vmem:[%s5076_s4 + $0x18] sm:$0xff]   ;;  %v4033_v2 = vld [vmem:[%s5076_s4 + $0x60] sm:$0xff]   ;;  %v4038_v9 = vld [vmem:[%s5076_s4 + $0x30] sm:$0xff]  }
 0x275   :  { %1081 = vst.msk [vmem:[#allocation2 + $0x18] sm:$0xff] %vm456_vm0, %v1079_v8  ;;  %v4037_v8 = vld [vmem:[%s5076_s4 + $0x70] sm:$0xff]  }
 0x276   :  { %845 = vrot.lane.b32.xlu1 %v841_v10, %s4105_s15  ;;  %1080 = vst.msk [vmem:[#allocation2 + $0x8] sm:$0xff] %vm456_vm0, %v1078_v11  ;;  %v4039_v11 = vld [vmem:[%s5076_s4 + $0x78] sm:$0xff]  }
 0x288   :  { %v609_v25 = vpop.permute.xlu1 %608 }
 0x290   :  { %v3641_v12 = vpop.f32.mrb[16].mxu1  ;;  %v4684_v13 = vpop.f32.mrb[48].mxu0 }
 0x291   :  { %v984_v14 = vpop.f32.mrb[17].mxu1  ;;  %v1211_v15 = vpop.f32.mrb[49].mxu0 }
 0x292   :  { %v3642_v17 = vpop.f32.mrb[18].mxu1  ;;  %v4686_v18 = vpop.f32.mrb[50].mxu0 }
 0x293   :  { %v1000_v19 = vpack.c.bf16 %v3642_v17, %v3641_v12  ;;  %v1227_v20 = vpack.c.bf16 %v4686_v18, %v4684_v13  ;;  %v987_v21 = vpop.f32.mrb[19].mxu1  ;;  %v1214_v22 = vpop.f32.mrb[51].mxu0  ;;  %v4040_v12 = vld [vmem:[%s5076_s4 + $0x38] sm:$0xff]  }
 0x294   :  { %v999_v23 = vpack.c.bf16 %v987_v21, %v984_v14  ;;  %v1226_v24 = vpack.c.bf16 %v1214_v22, %v1211_v15 }
 0x296   :  { %1230 = vrot.lane.b32.xlu1 %v1226_v24, %s4101_s27 }
 0x29a   :  { %924 = vrot.lane.b32.xlu1 %v920_v35, %s4106_s16 }
 0x29e   :  { %1003 = vrot.lane.b32.xlu1 %v999_v23, %s4107_s17 }
 0x2a2   :  { %531 = vrot.lane.b32.xlu1 %v526_v16, %s4102_s12 }
 0x2a6   :  { %610 = vrot.lane.b32.xlu1 %v605_v36, %s4101_s27 }
 0x2a8   :  { %v530_v26 = vpop.permute.xlu0 %529 }
 0x2a9   :  { %536 = vst.msk [vmem:[#allocation2] sm:$0xff] %vm535_vm1, %v530_v26  ;;  %v767_v42 = vpop.permute.xlu1 %766 }
 0x2aa   :  { %689 = vrot.lane.b32.xlu1 %v684_v57, %s4104_s3  ;;  %615 = vst.msk [vmem:[#allocation2] sm:$0xff] %vm614_vm2, %v609_v25 }
 0x2ae   :  { %768 = vrot.lane.b32.xlu1 %v763_v27, %s4103_s13 }
 0x2b0   :  { %v4705_v29 = vpop.f32.mrb[20].mxu1  ;;  %v4707_v30 = vpop.f32.mrb[52].mxu0 }
 0x2b1   :  { %v1133_v28 = vpop.f32.mrb[21].mxu1  ;;  %v1367_v31 = vpop.f32.mrb[53].mxu0 }
 0x2b2   :  { %v4709_v32 = vpop.f32.mrb[22].mxu1  ;;  %847 = vrot.lane.b32.xlu1 %v842_v6, %s4105_s15  ;;  %v4712_v33 = vpop.f32.mrb[54].mxu0  ;;  %v4036_v6 = vld [vmem:[%s5076_s4 + $0x28] sm:$0xff]  }
 0x2b3   :  { %v1149_v34 = vpack.c.bf16 %v4709_v32, %v4705_v29  ;;  %v1136_v36 = vpop.f32.mrb[23].mxu1  ;;  %v1383_v37 = vpack.c.bf16 %v4712_v33, %v4707_v30  ;;  %v1370_v38 = vpop.f32.mrb[55].mxu0 }
 0x2b4   :  { %v1148_v40 = vpack.c.bf16 %v1136_v36, %v1133_v28  ;;  %v1382_v41 = vpack.c.bf16 %v1370_v38, %v1367_v31 }
 0x2b6   :  { %926 = vrot.lane.b32.xlu1 %v921_v60, %s4106_s16  ;;  %1152 = vrot.lane.b32.xlu0 %v1148_v40, %s4102_s12  ;;  %v4030_v60 = vld [vmem:[%s5076_s4 + $0x10] sm:$0xff]  }
 0x2b7   :  { %3407 = vmatpush3.bf16.msra.mxu0 %v4030_v60 }
 0x2b8   :  { %3408 = vmatprep.subr.bf16.mxu0 %v4031_v63  ;;  %v4046_v63 = vld [vmem:[%s5078_s6 + $0x70] sm:$0xff]  }
 0x2ba   :  { %1005 = vrot.lane.b32.xlu1 %v1000_v19, %s4107_s17  ;;  %1386 = vrot.lane.b32.xlu0 %v1382_v41, %s4103_s13 }
 0x2bb   :  { %3409 = vmatpush3.bf16.msra.mxu0 %v4032_v1  ;;  %v4048_v1 = vld [vmem:[%s5078_s6 + $0x78] sm:$0xff]  }
 0x2bc   :  { %3410 = vmatprep.subr.bf16.mxu0 %v4033_v2  ;;  %v4049_v2 = vld [vmem:[%s5078_s6 + $0x20] sm:$0xff]  }
 0x2bf   :  { %3411 = vmatpush3.bf16.msra.mxu0 %v4034_v3 }
 0x2c0   :  { %3412 = vmatprep.subr.bf16.mxu0 %v4035_v4  ;;  %v4053_v4 = vld [vmem:[%s5078_s6 + $0x90] sm:$0xff]  }
 0x2c3   :  { %3413 = vmatpush3.bf16.msra.mxu0 %v4036_v6  ;;  %v4050_v6 = vld [vmem:[%s5078_s6 + $0x28] sm:$0xff]  }
 0x2c4   :  { %3414 = vmatprep.subr.bf16.mxu0 %v4037_v8  ;;  %v4051_v8 = vld [vmem:[%s5078_s6 + $0x30] sm:$0xff]  }
 0x2c7   :  { %3415 = vmatpush3.bf16.msra.mxu0 %v4038_v9 }
 0x2c8   :  { %v688_v47 = vpop.permute.xlu1 %687  ;;  %3416 = vmatprep.subr.bf16.mxu0 %v4039_v11 }
 0x2c9   :  { %694 = vst.msk [vmem:[#allocation2] sm:$0xff] %vm693_vm3, %v688_v47 }
 0x2ca   :  { %773 = vst.msk [vmem:[#allocation2] sm:$0xff] %vm772_vm4, %v767_v42 }
 0x2cb   :  { %3417 = vmatpush3.bf16.msra.mxu0 %v4040_v12 }
 0x2d0   :  { %v4724_v43 = vpop.f32.mrb[24].mxu1  ;;  %v4726_v44 = vpop.f32.mrb[56].mxu0 }
 0x2d1   :  { %v1289_v58 = vpop.f32.mrb[25].mxu1  ;;  %v1523_v45 = vpop.f32.mrb[57].mxu0 }
 0x2d2   :  { %v4728_v5 = vpop.f32.mrb[26].mxu1  ;;  %v4730_v16 = vpop.f32.mrb[58].mxu0 }
 0x2d3   :  { %v1305_v46 = vpack.c.bf16 %v4728_v5, %v4724_v43  ;;  %v1292_v27 = vpop.f32.mrb[27].mxu1  ;;  %v1539_v48 = vpack.c.bf16 %v4730_v16, %v4726_v44  ;;  %v1526_v49 = vpop.f32.mrb[59].mxu0  ;;  %v4041_v5 = vld [vmem:[%s5078_s6 + $0x10] sm:$0xff]  }
 0x2d4   :  { %v1304_v50 = vpack.c.bf16 %v1292_v27, %v1289_v58  ;;  %v1538_v39 = vpack.c.bf16 %v1526_v49, %v1523_v45  ;;  %v4042_v16 = vld [vmem:[%s5078_s6 + $0x50] sm:$0xff]   ;;  %v4043_v27 = vld [vmem:[%s5078_s6 + $0x18] sm:$0xff]  }
 0x2d6   :  { %1308 = vrot.lane.b32.xlu0 %v1304_v50, %s4104_s3  ;;  %v3046_v50 = vld [vmem:[%s5077_s5] ss:$0 sm:$0xff] }
 0x2da   :  { %1542 = vrot.lane.b32.xlu0 %v1538_v39, %s4106_s16 }
 0x2e8   :  { %v846_v52 = vpop.permute.xlu1 %845 }
 0x2e9   :  { %852 = vst.msk [vmem:[#allocation2] sm:$0xff] %vm851_vm5, %v846_v52 }
 0x2f0   :  { %v4754_v57 = vpop.f32.mrb[28].mxu1 }
 0x2f1   :  { %v1445_v59 = vpop.f32.mrb[29].mxu1 }
 0x2f2   :  { %v3762_v62 = vpop.f32.mrb[30].mxu1 }
 0x2f3   :  { %v1461_v35 = vpack.c.bf16 %v3762_v62, %v4754_v57  ;;  %v1448_v61 = vpop.f32.mrb[31].mxu1  ;;  %v4045_v62 = vld [vmem:[%s5078_s6] sm:$0xff]  }
 0x2f4   :  { %v1460_v0 = vpack.c.bf16 %v1448_v61, %v1445_v59 }
 0x2f6   :  { %1464 = vrot.lane.b32.xlu0 %v1460_v0, %s4105_s15  ;;  %v4047_v0 = vld [vmem:[%s5078_s6 + $0x8] sm:$0xff]  }
 0x308   :  { %v1231_v7 = vpop.permute.xlu1 %1230 }
 0x30c   :  { %v925_v10 = vpop.permute.xlu1 %924 }
 0x30d   :  { %931 = vst.msk [vmem:[#allocation2] sm:$0xff] %vm930_vm6, %v925_v10 }
 0x310   :  { %v3801_v14 = vpop.f32.mrb[32].mxu1  ;;  %v1004_v15 = vpop.permute.xlu1 %1003 }
 0x311   :  { %1010 = vst.msk [vmem:[#allocation2] sm:$0xff] %vm1009_vm7, %v1004_v15  ;;  %v1601_v17 = vpop.f32.mrb[33].mxu1 }
 0x312   :  { %v3802_v19 = vpop.f32.mrb[34].mxu1 }
 0x313   :  { %v1617_v21 = vpack.c.bf16 %v3802_v19, %v3801_v14  ;;  %v1604_v22 = vpop.f32.mrb[35].mxu1 }
 0x314   :  { %v1616_v23 = vpack.c.bf16 %v1604_v22, %v1601_v17  ;;  %v532_v24 = vpop.permute.xlu1 %531  ;;  %v4052_v17 = vld [vmem:[%s5078_s6 + $0x38] sm:$0xff]  }
 0x315   :  { %537 = vst.msk [vmem:[#allocation2 + $0x10] sm:$0xff] %vm535_vm1, %v532_v24 }
 0x316   :  { %1620 = vrot.lane.b32.xlu0 %v1616_v23, %s4107_s17  ;;  %v4054_v23 = vld [vmem:[%s5078_s6 + $0x40] sm:$0xff]  }
 0x318   :  { %v611_v25 = vpop.permute.xlu1 %610  ;;  %v1628_v40 = vld [vmem:[#allocation2] sm:$0xff] }
 0x319   :  { %616 = vst.msk [vmem:[#allocation2 + $0x10] sm:$0xff] %vm614_vm2, %v611_v25 }
 0x31a   :  { %1154 = vrot.lane.b32.xlu0 %v1149_v34, %s4102_s12 }
 0x31c   :  { %v690_v26 = vpop.permute.xlu1 %689 }
 0x31d   :  { %695 = vst.msk [vmem:[#allocation2 + $0x10] sm:$0xff] %vm693_vm3, %v690_v26 }
 0x31e   :  { %1232 = vrot.lane.b32.xlu0 %v1227_v20, %s4101_s27 }
 0x320   :  { %v769_v28 = vpop.permute.xlu1 %768 }
 0x321   :  { %774 = vst.msk [vmem:[#allocation2 + $0x10] sm:$0xff] %vm772_vm4, %v769_v28 }
 0x322   :  { %1310 = vrot.lane.b32.xlu0 %v1305_v46, %s4104_s3  ;;  %v4108_v46 = vmov 0.0  }
 0x323   :  { %3803 = vmatprep.subr.bf16.mxu1 %v4108_v46  ;;  %3843 = vmatprep.subr.bf16.mxu0 %v4108_v46 }
 0x324   :  { %v848_v31 = vpop.permute.xlu1 %847  ;;  %3804 = vmatpush3.bf16.msra.mxu1 %v4041_v5  ;;  %3807 = vmatprep.mubr.msk.bf16.mxu1 %vm4109_vm8, %v4108_v46 }
 0x325   :  { %853 = vst.msk [vmem:[#allocation2 + $0x10] sm:$0xff] %vm851_vm5, %v848_v31  ;;  %3805 = vmatprep.subr.bf16.mxu1 %v4108_v46  ;;  %v4056_v31 = vld [vmem:[%s5078_s6 + $0x48] sm:$0xff]  }
 0x326   :  { %1388 = vrot.lane.b32.xlu0 %v1383_v37, %s4103_s13 }
 0x328   :  { %v927_v29 = vpop.permute.xlu1 %926  ;;  %v1153_v32 = vpop.permute.xlu0 %1152  ;;  %3806 = vmatpush3.bf16.msra.mxu1 %v4043_v27  ;;  %v4071_v27 = vld [vmem:[%s5078_s6 + $0xe0] sm:$0xff]  }
 0x329   :  { %932 = vst.msk [vmem:[#allocation2 + $0x10] sm:$0xff] %vm930_vm6, %v927_v29  ;;  %3811 = vmatprep.subr.bf16.mxu1 %v4108_v46  ;;  %v4057_v29 = vld [vmem:[%s5078_s6 + $0xb0] sm:$0xff]  }
 0x32a   :  { %1158 = vst.msk [vmem:[#allocation2 + $0x8] sm:$0xff] %vm535_vm1, %v1153_v32  ;;  %1466 = vrot.lane.b32.xlu0 %v1461_v35, %s4105_s15 }
 0x32b   :  { %1236 = vst.msk [vmem:[#allocation2 + $0x8] sm:$0xff] %vm614_vm2, %v1231_v7  ;;  %v4055_v7 = vld [vmem:[%s5078_s6 + $0x98] sm:$0xff]  }
 0x32c   :  { %v1006_v13 = vpop.permute.xlu1 %1005  ;;  %v1387_v18 = vpop.permute.xlu0 %1386 }
 0x32d   :  { %1011 = vst.msk [vmem:[#allocation2 + $0x10] sm:$0xff] %vm1009_vm7, %v1006_v13  ;;  %v4058_v13 = vld [vmem:[%s5078_s6 + $0x60] sm:$0xff]  }
 0x32e   :  { %1544 = vrot.lane.b32.xlu0 %v1539_v48, %s4106_s16  ;;  %v4044_v48 = vld [vmem:[%s5078_s6 + $0x58] sm:$0xff]  }
 0x332   :  { %1622 = vrot.lane.b32.xlu0 %v1617_v21, %s4107_s17 }
 0x334   :  { %v1630_v45 = vld [vmem:[#allocation2 + $0x10] sm:$0xff] }
 0x348   :  { %v1309_v20 = vpop.permute.xlu0 %1308 }
 0x349   :  { %1314 = vst.msk [vmem:[#allocation2 + $0x8] sm:$0xff] %vm693_vm3, %v1309_v20 }
 0x34a   :  { %1392 = vst.msk [vmem:[#allocation2 + $0x8] sm:$0xff] %vm772_vm4, %v1387_v18  ;;  %v4059_v18 = vld [vmem:[%s5078_s6 + $0xb8] sm:$0xff]  }
 0x34c   :  { %v1543_v30 = vpop.permute.xlu0 %1542 }
 0x368   :  { %v1465_v33 = vpop.permute.xlu0 %1464 }
 0x369   :  { %1470 = vst.msk [vmem:[#allocation2 + $0x8] sm:$0xff] %vm851_vm5, %v1465_v33  ;;  %v4061_v33 = vld [vmem:[%s5078_s6 + $0xd0] sm:$0xff]  }
 0x36a   :  { %1548 = vst.msk [vmem:[#allocation2 + $0x8] sm:$0xff] %vm930_vm6, %v1543_v30  ;;  %v4060_v30 = vld [vmem:[%s5078_s6 + $0x68] sm:$0xff]  }
 0x388   :  { %v1621_v34 = vpop.permute.xlu0 %1620 }
 0x389   :  { %1626 = vst.msk [vmem:[#allocation2 + $0x8] sm:$0xff] %vm1009_vm7, %v1621_v34 }
 0x38c   :  { %v1155_v36 = vpop.permute.xlu0 %1154 }
 0x38d   :  { %1159 = vst.msk [vmem:[#allocation2 + $0x18] sm:$0xff] %vm535_vm1, %v1155_v36  ;;  %v4062_v36 = vld [vmem:[%s5078_s6 + $0x80] sm:$0xff]  }
 0x390   :  { %v1233_v37 = vpop.permute.xlu0 %1232  ;;  %v1629_v38 = vld [vmem:[#allocation2 + $0x8] sm:$0xff] }
 0x391   :  { %1237 = vst.msk [vmem:[#allocation2 + $0x18] sm:$0xff] %vm614_vm2, %v1233_v37  ;;  %1799 = vmatprep.mubr.bf16.mxu0 %v1629_v38  ;;  %v4063_v37 = vld [vmem:[%s5078_s6 + $0xd8] sm:$0xff]  }
 0x392   :  { %1800 = vmatmul.mubr.bf16.vlgmr.msra.gmra.mrb[60].mxu0 %v1628_v40  ;;  %v4064_v40 = vld [vmem:[%s5078_s6 + $0x88] sm:$0xff]  }
 0x393   :  { %3844 = vmatpush3.bf16.msra.mxu0 %v4042_v16  ;;  %v4070_v16 = vld [vmem:[%s5078_s6 + $0xc8] sm:$0xff]  }
 0x394   :  { %v1311_v41 = vpop.permute.xlu0 %1310  ;;  %3845 = vmatprep.subr.bf16.mxu0 %v4108_v46 }
 0x395   :  { %1315 = vst.msk [vmem:[#allocation2 + $0x18] sm:$0xff] %vm693_vm3, %v1311_v41  ;;  %v4065_v41 = vld [vmem:[%s5078_s6 + $0xf0] sm:$0xff]  }
 0x397   :  { %3846 = vmatpush3.bf16.msra.mxu0 %v4044_v48 }
 0x398   :  { %v1389_v42 = vpop.permute.xlu0 %1388  ;;  %3859 = vmatprep.subr.bf16.mxu0 %v4108_v46 }
 0x399   :  { %1393 = vst.msk [vmem:[#allocation2 + $0x18] sm:$0xff] %vm772_vm4, %v1389_v42 }
 0x39c   :  { %v1467_v47 = vpop.permute.xlu0 %1466 }
 0x39d   :  { %1471 = vst.msk [vmem:[#allocation2 + $0x18] sm:$0xff] %vm851_vm5, %v1467_v47  ;;  %v4066_v47 = vld [vmem:[%s5078_s6 + $0xa0] sm:$0xff]  }
 0x3a0   :  { %v1545_v43 = vpop.permute.xlu0 %1544 }
 0x3a1   :  { %1549 = vst.msk [vmem:[#allocation2 + $0x18] sm:$0xff] %vm930_vm6, %v1545_v43  ;;  %v4067_v43 = vld [vmem:[%s5078_s6 + $0xf8] sm:$0xff]  }
 0x3a4   :  { %v1623_v44 = vpop.permute.xlu0 %1622 }
 0x3a5   :  { %1627 = vst.msk [vmem:[#allocation2 + $0x18] sm:$0xff] %vm1009_vm7, %v1623_v44  ;;  %v4068_v44 = vld [vmem:[%s5078_s6 + $0xa8] sm:$0xff]  }
 0x3ac   :  { %v1631_v58 = vld [vmem:[#allocation2 + $0x18] sm:$0xff] }
 0x3ad   :  { %1807 = vmatprep.mubr.bf16.mxu0 %v1631_v58 }
 0x3ae   :  { %1808 = vmatmul.mubr.bf16.gmra.mrb[64].mxu0 %v1630_v45  ;;  %v4069_v45 = vld [vmem:[%s5078_s6 + $0xc0] sm:$0xff]  }
 0x3af   :  { %3847 = vmatprep.mubr.msk.bf16.mxu0 %vm4109_vm8, %v4108_v46 }
 0x465   :  { %v3418_v49 = vpop.f32.mrb[60].mxu0 }
 0x466   :  { %v3419_v39 = vpop.f32.mrb[61].mxu0 }
 0x467   :  { %v3420_v52 = vadd.f32 %v3419_v39, %v3418_v49  ;;  %v3421_v53 = vpop.f32.mrb[62].mxu0  ;;  %v4072_v49 = vld [vmem:[%s5078_s6 + $0xe8] sm:$0xff]   ;;  %v4073_v39 = vld [vmem:[%s5080_s8] sm:$0xff]  }
 0x468   :  { %v3422_v54 = vpop.f32.mrb[63].mxu0 }
 0x469   :  { %v1802_v51 = vadd.f32 %v3420_v52, %v3046_v50  ;;  %v3423_v55 = vadd.f32 %v3422_v54, %v3421_v53  ;;  %v4074_v52 = vld [vmem:[%s5080_s8 + $0x8] sm:$0xff]   ;;  %v4075_v53 = vld [vmem:[%s5080_s8 + $0x10] sm:$0xff]   ;;  %v4076_v54 = vld [vmem:[%s5080_s8 + $0x18] sm:$0xff]  }
 0x46b   :  { %v1805_v56 = vadd.f32 %v3423_v55, %v3046_v50  ;;  %v1816_v57 = vmax.f32 %v1802_v51, 0.0 }
 0x46d   :  { %v1817_v59 = vmax.f32 %v1805_v56, 0.0 }
 0x46f   :  { %v4862_v60 = vpack.c.bf16 %v1817_v59, %v1816_v57 }
 0x471   :  { %v1832_v35 = vrot.slane %v4862_v60, 1  ;;  %v2135_v61 = vrot.slane %v4862_v60, 5  ;;  %v2259_v3 = vrot.slane %v4862_v60, 7  ;;  %v1949_v10 = vrot.slane %v4862_v60, 2 }
 0x472   :  { %v2011_v26 = vrot.slane %v4862_v60, 3  ;;  %v2073_v20 = vrot.slane %v4862_v60, 4  ;;  %v2197_v38 = vrot.slane %v4862_v60, 6 }
 0x473   :  { %3808 = vmatmul.mubr.msk.bf16.vlgmr.msra.gmra.mrb[36].mxu1 %vm1845_vm9, %v1832_v35  ;;  %3848 = vmatmul.mubr.msk.bf16.vlgmr.msra.gmra.mrb[68].mxu0 %vm1845_vm9, %v2135_v61 }
 0x474   :  { %3812 = vmatpush3.bf16.msra.mxu1 %v4045_v62  ;;  %3860 = vmatpush3.bf16.msra.mxu0 %v4046_v63 }
 0x475   :  { %3813 = vmatprep.subr.bf16.mxu1 %v4108_v46  ;;  %3861 = vmatprep.subr.bf16.mxu0 %v4108_v46 }
 0x476   :  { %3815 = vmatprep.mubr.msk.bf16.mxu1 %vm4109_vm8, %v4108_v46  ;;  %3863 = vmatprep.mubr.msk.bf16.mxu0 %vm4109_vm8, %v4108_v46 }
 0x478   :  { %3814 = vmatpush3.bf16.msra.mxu1 %v4047_v0  ;;  %3862 = vmatpush3.bf16.msra.mxu0 %v4048_v1 }
 0x479   :  { %3819 = vmatprep.subr.bf16.mxu1 %v4108_v46  ;;  %3875 = vmatprep.subr.bf16.mxu0 %v4108_v46 }
 0x47b   :  { %3816 = vmatmul.mubr.msk.bf16.vlgmr.msra.gmra.mrb[40].mxu1 %vm1845_vm9, %v4862_v60  ;;  %3864 = vmatmul.mubr.msk.bf16.vlgmr.msra.gmra.mrb[72].mxu0 %vm1845_vm9, %v2259_v3 }
 0x47c   :  { %3820 = vmatpush3.bf16.msra.mxu1 %v4049_v2  ;;  %3823 = vmatprep.mubr.msk.bf16.mxu1 %vm4109_vm8, %v4108_v46 }
 0x47d   :  { %3821 = vmatprep.subr.bf16.mxu1 %v4108_v46  ;;  %3876 = vmatpush3.bf16.msra.mxu0 %v4053_v4 }
 0x47e   :  { %3877 = vmatprep.subr.bf16.mxu0 %v4108_v46  ;;  %3879 = vmatprep.mubr.msk.bf16.mxu0 %vm4109_vm8, %v4108_v46 }
 0x480   :  { %3822 = vmatpush3.bf16.msra.mxu1 %v4050_v6 }
 0x481   :  { %v3424_v9 = vpop.f32.mrb[64].mxu0  ;;  %3827 = vmatprep.subr.bf16.mxu1 %v4108_v46  ;;  %3878 = vmatpush3.bf16.msra.mxu0 %v4055_v7 }
 0x482   :  { %v3425_v11 = vpop.f32.mrb[65].mxu0  ;;  %3891 = vmatprep.subr.bf16.mxu0 %v4108_v46 }
 0x483   :  { %v3426_v12 = vadd.f32 %v3425_v11, %v3424_v9  ;;  %v3427_v14 = vpop.f32.mrb[66].mxu0  ;;  %3824 = vmatmul.mubr.msk.bf16.vlgmr.msra.gmra.mrb[44].mxu1 %vm1845_vm9, %v1949_v10 }
 0x484   :  { %3828 = vmatpush3.bf16.msra.mxu1 %v4051_v8  ;;  %v3428_v15 = vpop.f32.mrb[67].mxu0  ;;  %3831 = vmatprep.mubr.msk.bf16.mxu1 %vm4109_vm8, %v4108_v46 }
 0x485   :  { %v1810_v19 = vadd.f32 %v3426_v12, %v3046_v50  ;;  %v3429_v21 = vadd.f32 %v3428_v15, %v3427_v14  ;;  %3829 = vmatprep.subr.bf16.mxu1 %v4108_v46 }
 0x487   :  { %v1813_v22 = vadd.f32 %v3429_v21, %v3046_v50  ;;  %v1818_v24 = vmax.f32 %v1810_v19, 0.0 }
 0x488   :  { %3830 = vmatpush3.bf16.msra.mxu1 %v4052_v17 }
 0x489   :  { %v1819_v25 = vmax.f32 %v1813_v22, 0.0  ;;  %3835 = vmatprep.subr.bf16.mxu1 %v4108_v46 }
 0x48b   :  { %v4928_v28 = vpack.c.bf16 %v1819_v25, %v1818_v24  ;;  %3832 = vmatmul.mubr.msk.bf16.vlgmr.msra.gmra.mrb[48].mxu1 %vm1845_vm9, %v2011_v26 }
 0x48c   :  { %3836 = vmatpush3.bf16.msra.mxu1 %v4054_v23  ;;  %3839 = vmatprep.mubr.msk.bf16.mxu1 %vm4109_vm8, %v4108_v46 }
 0x48d   :  { %3837 = vmatprep.subr.bf16.mxu1 %v4108_v46  ;;  %v2383_v32 = vrot.slane %v4928_v28, 1  ;;  %v2507_v34 = vrot.slane %v4928_v28, 3  ;;  %v2631_v42 = vrot.slane %v4928_v28, 5  ;;  %v2755_v58 = vrot.slane %v4928_v28, 7 }
 0x48e   :  { %v2445_v5 = vrot.slane %v4928_v28, 2  ;;  %v2569_v48 = vrot.slane %v4928_v28, 4  ;;  %v2693_v50 = vrot.slane %v4928_v28, 6 }
 0x48f   :  { %3880 = vmatmul.mubr.msk.bf16.vlgmr.msra.gmra.mrb[76].mxu0 %vm1845_vm9, %v2383_v32 }
 0x490   :  { %3838 = vmatpush3.bf16.msra.mxu1 %v4056_v31  ;;  %3892 = vmatpush3.bf16.msra.mxu0 %v4057_v29 }
 0x491   :  { %3851 = vmatprep.subr.bf16.mxu1 %v4108_v46  ;;  %3893 = vmatprep.subr.bf16.mxu0 %v4108_v46 }
 0x492   :  { %3895 = vmatprep.mubr.msk.bf16.mxu0 %vm4109_vm8, %v4108_v46 }
 0x493   :  { %3840 = vmatmul.mubr.msk.bf16.vlgmr.msra.gmra.mrb[52].mxu1 %vm1845_vm9, %v2073_v20 }
 0x494   :  { %3852 = vmatpush3.bf16.msra.mxu1 %v4058_v13  ;;  %3894 = vmatpush3.bf16.msra.mxu0 %v4059_v18 }
 0x495   :  { %3853 = vmatprep.subr.bf16.mxu1 %v4108_v46  ;;  %3907 = vmatprep.subr.bf16.mxu0 %v4108_v46 }
 0x496   :  { %3855 = vmatprep.mubr.msk.bf16.mxu1 %vm4109_vm8, %v4108_v46 }
 0x497   :  { %3896 = vmatmul.mubr.msk.bf16.vlgmr.msra.gmra.mrb[80].mxu0 %vm1845_vm9, %v2507_v34 }
 0x498   :  { %3854 = vmatpush3.bf16.msra.mxu1 %v4060_v30  ;;  %3908 = vmatpush3.bf16.msra.mxu0 %v4061_v33 }
 0x499   :  { %3867 = vmatprep.subr.bf16.mxu1 %v4108_v46  ;;  %3909 = vmatprep.subr.bf16.mxu0 %v4108_v46 }
 0x49a   :  { %3911 = vmatprep.mubr.msk.bf16.mxu0 %vm4109_vm8, %v4108_v46 }
 0x49b   :  { %3856 = vmatmul.mubr.msk.bf16.vlgmr.msra.gmra.mrb[56].mxu1 %vm1845_vm9, %v2197_v38 }
 0x49c   :  { %3868 = vmatpush3.bf16.msra.mxu1 %v4062_v36  ;;  %3910 = vmatpush3.bf16.msra.mxu0 %v4063_v37 }
 0x49d   :  { %3869 = vmatprep.subr.bf16.mxu1 %v4108_v46  ;;  %3923 = vmatprep.subr.bf16.mxu0 %v4108_v46 }
 0x49e   :  { %3871 = vmatprep.mubr.msk.bf16.mxu1 %vm4109_vm8, %v4108_v46 }
 0x49f   :  { %3912 = vmatmul.mubr.msk.bf16.vlgmr.msra.gmra.mrb[84].mxu0 %vm1845_vm9, %v2631_v42 }
 0x4a0   :  { %3870 = vmatpush3.bf16.msra.mxu1 %v4064_v40  ;;  %3924 = vmatpush3.bf16.msra.mxu0 %v4065_v41 }
 0x4a1   :  { %3883 = vmatprep.subr.bf16.mxu1 %v4108_v46  ;;  %3925 = vmatprep.subr.bf16.mxu0 %v4108_v46 }
 0x4a2   :  { %3927 = vmatprep.mubr.msk.bf16.mxu0 %vm4109_vm8, %v4108_v46 }
 0x4a3   :  { %3872 = vmatmul.mubr.msk.bf16.vlgmr.msra.gmra.mrb[60].mxu1 %vm1845_vm9, %v4928_v28 }
 0x4a4   :  { %3884 = vmatpush3.bf16.msra.mxu1 %v4066_v47  ;;  %3926 = vmatpush3.bf16.msra.mxu0 %v4067_v43 }
 0x4a5   :  { %3885 = vmatprep.subr.bf16.mxu1 %v4108_v46  ;;  %3887 = vmatprep.mubr.msk.bf16.mxu1 %vm4109_vm8, %v4108_v46 }
 0x4a7   :  { %3928 = vmatmul.mubr.msk.bf16.vlgmr.msra.gmra.mrb[88].mxu0 %vm1845_vm9, %v2755_v58 }
 0x4a8   :  { %3886 = vmatpush3.bf16.msra.mxu1 %v4068_v44 }
 0x4a9   :  { %3899 = vmatprep.subr.bf16.mxu1 %v4108_v46 }
 0x4ab   :  { %3888 = vmatmul.mubr.msk.bf16.vlgmr.msra.gmra.mrb[64].mxu1 %vm1845_vm9, %v2445_v5 }
 0x4ac   :  { %3900 = vmatpush3.bf16.msra.mxu1 %v4069_v45  ;;  %3903 = vmatprep.mubr.msk.bf16.mxu1 %vm4109_vm8, %v4108_v46 }
 0x4ad   :  { %3901 = vmatprep.subr.bf16.mxu1 %v4108_v46 }
 0x4b0   :  { %3902 = vmatpush3.bf16.msra.mxu1 %v4070_v16 }
 0x4b1   :  { %3915 = vmatprep.subr.bf16.mxu1 %v4108_v46 }
 0x4b3   :  { %3904 = vmatmul.mubr.msk.bf16.vlgmr.msra.gmra.mrb[68].mxu1 %vm1845_vm9, %v2569_v48 }
 0x4b4   :  { %3916 = vmatpush3.bf16.msra.mxu1 %v4071_v27  ;;  %3919 = vmatprep.mubr.msk.bf16.mxu1 %vm4109_vm8, %v4108_v46 }
 0x4b5   :  { %3917 = vmatprep.subr.bf16.mxu1 %v4108_v46 }
 0x4b8   :  { %3918 = vmatpush3.bf16.msra.mxu1 %v4072_v49 }
 0x4b9   :  { %3931 = vmatprep.subr.bf16.mxu1 %v4108_v46 }
 0x4bb   :  { %3920 = vmatmul.mubr.msk.bf16.vlgmr.msra.gmra.mrb[72].mxu1 %vm1845_vm9, %v2693_v50 }
 0x4bc   :  { %3939 = vmatprep.mubr.msk.bf16.mxu1 %vm4109_vm8, %v4108_v46  ;;  %3932 = vmatpush3.bf16.msra.mxu1 %v4073_v39 }
 0x4bd   :  { %3933 = vmatprep.subr.bf16.mxu1 %v4108_v46 }
 0x4c0   :  { %3934 = vmatpush3.bf16.msra.mxu1 %v4074_v52 }
 0x4c1   :  { %3935 = vmatprep.subr.bf16.mxu1 %v4108_v46 }
 0x4c4   :  { %3936 = vmatpush3.bf16.msra.mxu1 %v4075_v53 }
 0x4c5   :  { %3937 = vmatprep.subr.bf16.mxu1 %v4108_v46 }
 0x4c8   :  { %3938 = vmatpush3.bf16.msra.mxu1 %v4076_v54 }
 0x546   :  { %v1883_v51 = vpop.f32.mrb[36].mxu1  ;;  %v2185_v55 = vpop.f32.mrb[68].mxu0 }
 0x547   :  { %v3809_v56 = vpop.f32.mrb[37].mxu1  ;;  %v3849_v57 = vpop.f32.mrb[69].mxu0 }
 0x548   :  { %v1886_v59 = vpop.f32.mrb[38].mxu1  ;;  %v2188_v60 = vpop.f32.mrb[70].mxu0 }
 0x549   :  { %v3810_v62 = vpop.f32.mrb[39].mxu1  ;;  %v3850_v63 = vpop.f32.mrb[71].mxu0 }
 0x54e   :  { %v1938_v35 = vpop.f32.mrb[40].mxu1  ;;  %v2309_v61 = vpop.f32.mrb[72].mxu0 }
 0x54f   :  { %v1939_v0 = vadd.f32 %v1938_v35, %v1883_v51  ;;  %v3817_v1 = vpop.f32.mrb[41].mxu1  ;;  %v3865_v2 = vpop.f32.mrb[73].mxu0 }
 0x550   :  { %v1941_v3 = vpop.f32.mrb[42].mxu1  ;;  %v2312_v46 = vpop.f32.mrb[74].mxu0  ;;  %v3171_v2 = vld [vmem:[%s5079_s7] ss:$0 sm:$0xff]  ;;  %s4077_s7 = scalar_lea.vmem %s2914_s11, 32 }
 0x551   :  { %v3818_v4 = vpop.f32.mrb[43].mxu1  ;;  %v3866_v6 = vpop.f32.mrb[75].mxu0  ;;  %p4078_p0 = scmp.ne.s32.totalorder %s2914_s11, %s4077_s7  ;;  %p4083_p2 = scmp.lt.s32.totalorder %s4077_s7, %s4077_s7 }
 0x553   :  { %p4084_p3 = por %p4083_p2, %p4082_p1 }
 0x555   :  { %p4085_p4 = pnand %p4084_p3, %p4078_p0 }
 0x556   :  { %v1999_v7 = vpop.f32.mrb[44].mxu1 }
 0x557   :  { %v2005_v8 = vadd.f32 %v1999_v7, %v1939_v0  ;;  %v3825_v9 = vpop.f32.mrb[45].mxu1 }
 0x558   :  { %v2002_v10 = vpop.f32.mrb[46].mxu1  ;;  %v3172_v9 = vld [vmem:[%s5081_s9] ss:$0 sm:$0xff] }
 0x559   :  { %v3826_v11 = vpop.f32.mrb[47].mxu1 }
 0x55e   :  { %v2061_v12 = vpop.f32.mrb[48].mxu1 }
 0x55f   :  { %v2067_v14 = vadd.f32 %v2061_v12, %v2005_v8  ;;  %v3833_v15 = vpop.f32.mrb[49].mxu1 }
 0x560   :  { %v2064_v17 = vpop.f32.mrb[50].mxu1 }
 0x561   :  { %v3834_v19 = vpop.f32.mrb[51].mxu1 }
 0x562   :  { %v2433_v21 = vpop.f32.mrb[76].mxu0 }
 0x563   :  { %v3881_v22 = vpop.f32.mrb[77].mxu0 }
 0x564   :  { %v2436_v23 = vpop.f32.mrb[78].mxu0 }
 0x565   :  { %v3882_v24 = vpop.f32.mrb[79].mxu0 }
 0x566   :  { %v2123_v25 = vpop.f32.mrb[52].mxu1 }
 0x567   :  { %v2129_v26 = vadd.f32 %v2123_v25, %v2067_v14  ;;  %v3841_v28 = vpop.f32.mrb[53].mxu1 }
 0x568   :  { %v2126_v31 = vpop.f32.mrb[54].mxu1 }
 0x569   :  { %v3842_v29 = vpop.f32.mrb[55].mxu1  ;;  %v2191_v32 = vadd.f32 %v2185_v55, %v2129_v26 }
 0x56a   :  { %v2557_v13 = vpop.f32.mrb[80].mxu0 }
 0x56b   :  { %v3897_v18 = vpop.f32.mrb[81].mxu0 }
 0x56c   :  { %v2560_v20 = vpop.f32.mrb[82].mxu0 }
 0x56d   :  { %v3898_v30 = vpop.f32.mrb[83].mxu0 }
 0x56e   :  { %v2247_v33 = vpop.f32.mrb[56].mxu1 }
 0x56f   :  { %v2253_v34 = vadd.f32 %v2247_v33, %v2191_v32  ;;  %v3857_v36 = vpop.f32.mrb[57].mxu1 }
 0x570   :  { %v2250_v37 = vpop.f32.mrb[58].mxu1 }
 0x571   :  { %v3858_v38 = vpop.f32.mrb[59].mxu1  ;;  %v2315_v40 = vadd.f32 %v2309_v61, %v2253_v34 }
 0x572   :  { %v2681_v41 = vpop.f32.mrb[84].mxu0 }
 0x573   :  { %v3913_v42 = vpop.f32.mrb[85].mxu0 }
 0x574   :  { %v2684_v47 = vpop.f32.mrb[86].mxu0 }
 0x575   :  { %v3914_v43 = vpop.f32.mrb[87].mxu0 }
 0x576   :  { %v2370_v44 = vpop.f32.mrb[60].mxu1 }
 0x577   :  { %v2376_v58 = vadd.f32 %v2370_v44, %v2315_v40  ;;  %v3873_v45 = vpop.f32.mrb[61].mxu1 }
 0x578   :  { %v2373_v5 = vpop.f32.mrb[62].mxu1 }
 0x579   :  { %v3874_v16 = vpop.f32.mrb[63].mxu1  ;;  %v2439_v27 = vadd.f32 %v2433_v21, %v2376_v58 }
 0x57a   :  { %v2805_v48 = vpop.f32.mrb[88].mxu0 }
 0x57b   :  { %v3929_v49 = vpop.f32.mrb[89].mxu0 }
 0x57c   :  { %v2808_v50 = vpop.f32.mrb[90].mxu0 }
 0x57d   :  { %v3930_v39 = vpop.f32.mrb[91].mxu0 }
 0x57e   :  { %v2495_v52 = vpop.f32.mrb[64].mxu1 }
 0x57f   :  { %v2501_v53 = vadd.f32 %v2495_v52, %v2439_v27  ;;  %v3889_v54 = vpop.f32.mrb[65].mxu1 }
 0x580   :  { %v2498_v51 = vpop.f32.mrb[66].mxu1 }
 0x581   :  { %v3890_v55 = vpop.f32.mrb[67].mxu1  ;;  %v2563_v56 = vadd.f32 %v2557_v13, %v2501_v53 }
 0x586   :  { %v2619_v57 = vpop.f32.mrb[68].mxu1 }
 0x587   :  { %v2625_v59 = vadd.f32 %v2619_v57, %v2563_v56  ;;  %v3905_v60 = vpop.f32.mrb[69].mxu1 }
 0x588   :  { %v2622_v62 = vpop.f32.mrb[70].mxu1 }
 0x589   :  { %v3906_v63 = vpop.f32.mrb[71].mxu1  ;;  %v2687_v35 = vadd.f32 %v2681_v41, %v2625_v59 }
 0x58e   :  { %v2743_v61 = vpop.f32.mrb[72].mxu1 }
 0x58f   :  { %v2749_v0 = vadd.f32 %v2743_v61, %v2687_v35  ;;  %v3921_v1 = vpop.f32.mrb[73].mxu1 }
 0x590   :  { %v2746_v3 = vpop.f32.mrb[74].mxu1 }
 0x591   :  { %v2811_v46 = vadd.f32 %v2805_v48, %v2749_v0  ;;  %v3922_v4 = vpop.f32.mrb[75].mxu1 }
 0x593   :  { %v2819_v6 = vadd.f32 %v3171_v2, %v2811_v46 }
 0x595   :  { %v2820_v7 = vmax.f32 %v2819_v6, 0.0 }
 0x597   :  { %v2821_v8 = vpack.c.bf16 %v2820_v7, %v2820_v7 }
 0x599   :  { %3940 = vmatmul.mubr.msk.bf16.vlgmr.msra.gmra.mrb[76].mxu1 %vm2861_vm10, %v2821_v8 }
 0x66c   :  { %v2899_v10 = vpop.f32.mrb[76].mxu1 }
 0x66d   :  { %v2900_v11 = vadd.f32 %v3172_v9, %v2899_v10  ;;  %v3941_v12 = vpop.f32.mrb[77].mxu1 }
 0x66e   :  { %v2902_v14 = vpop.f32.mrb[78].mxu1 }
 0x66f   :  { %v3942_v15 = vpop.f32.mrb[79].mxu1  ;;  %2906 = vst.msk [vmem:[#allocation3] sm:$0x3] %vm2905_vm11, %v2900_v11 }
 0x670   :  { %4088 = shalt.err (!%p4085_p4)
}
 0x671   :  { %s4089_s9 = scalar_lea.hbm %s5082_s10, 32 }
 0x672   :  { %p4090_p5 = scmp.ne.s32.totalorder %s5082_s10, %s4089_s9  ;;  %p4093_p6 = scmp.lt.u32.totalorder %s4089_s9, %s5082_s10 }
 0x674   :  { %p4095_p7 = pnand %p4093_p6, %p4090_p5 }
 0x676   :  { %4098 = shalt.err (!%p4095_p7)
}
 0x677   :  { %2916 = dma.vmem_to_hbm [thread:$0]  %s2914_s11, 32, %s5082_s10, [#allocation4]  }
 0x678   :  { %4099 = dma.done.wait [#allocation4], 32  }
 0x679   :  { %4100 = vsyncadd [#allocation4], 4294967264 }
 0x67a   :  { %2920 = vsyncpa [#allocation4], 1 }

</bundles_post_ra>
